<compile_context>
chip_gen: v6e
topology: v6e:2x2x1
jax: 0.10.0
libtpu: 0.0.40
codegen_flags: <defaults>
</compile_context>

<pallas_src>
import functools

import jax
import jax.numpy as jnp
from jax import lax
from jax.experimental import pallas as pl
from jax.experimental.pallas import tpu as pltpu


def _round_up(x, m):
    return (x + m - 1) // m * m


def _pick_row_tile(ho, row_tile):
    """Largest tile <= row_tile; prefer divisors of ho, else masked tail."""
    cap = max(1, min(row_tile, ho))
    best = 1
    for t in range(cap, 0, -1):
        if ho % t == 0:
            best = t
            break
    # If the best exact divisor is much smaller than requested, a non-dividing
    # tile + masked tail beats many skinny MXU calls / many grid steps.
    if best * 2 < cap:
        return cap
    return best


def _vmem_limit_bytes():
    """~75% of physical VMEM: ~96 MiB on v5e/v6e (128 MiB), ~48 MiB on v7x (64 MiB)."""
    try:
        cap = pltpu.get_tpu_info().vmem_capacity_bytes
        return int(min(100 * 1024 * 1024, (cap * 3) // 4))
    except Exception:
        return 48 * 1024 * 1024


def _block_spec(shape, index_map, single_buffer=False):
    if single_buffer:
        # Large, grid-revisited operand: keep a single VMEM copy instead of the
        # default double buffer (halves resident footprint; matters on v7x).
        try:
            return pl.BlockSpec(shape, index_map, pipeline_mode=pl.Buffered(1))
        except TypeError:  # jax without pipeline_mode support
            pass
    return pl.BlockSpec(shape, index_map)


def _conv_stats_kernel(x_ref, w_ref, conv_ref, stats_ref, *, ksize, stride, ho_valid):
    """One (batch, row-tile) grid step.

    x_ref:     (1, Hp, Wp, Cin)   reflect-padded input image (bf16, resident per batch)
    w_ref:     (K*K*Cin, Cp)      (kh, kw, cin)-major conv weight, Cout padded to 128 (bf16)
    conv_ref:  (1, TH, Wo, Cp)    raw conv output tile (bf16)
    stats_ref: (1, 1, 8, Cp)      rows 0/1 = per-tile [sum, sum_sq] BN partials (f32)
    """
    r = pl.program_id(1)
    _, th, wo, cp = conv_ref.shape
    cin = x_ref.shape[3]

    in_rows = (th - 1) * stride + ksize
    row0 = pl.multiple_of(r * (th * stride), th * stride)
    slab = x_ref[:, pl.ds(row0, in_rows), :, :]                # (1, in_rows, Wp, Cin)

    def tap(kh, kw):
        return slab[:, kh:kh + (th - 1) * stride + 1:stride,
                    kw:kw + (wo - 1) * stride + 1:stride, :]   # (1, TH, Wo, Cin)

    if cin >= 128:
        # Contraction depth Cin is already MXU-deep: accumulate K*K per-tap
        # matmuls in f32.  No lane-axis concat / big reshape relayout, and the
        # live working set shrinks by ~K*K (v7x MRB accumulates in place).
        acc = jnp.zeros((th * wo, cp), jnp.float32)
        for kh in range(ksize):
            for kw in range(ksize):
                base = (kh * ksize + kw) * cin
                lhs = tap(kh, kw).reshape(th * wo, cin)
                acc = acc + jnp.dot(lhs, w_ref[base:base + cin, :],
                                    preferred_element_type=jnp.float32)
    else:
        # Shallow channels (first layer): fold the K*K taps into the contraction
        # dim so the single matmul still has a deep contraction.
        parts = [tap(kh, kw) for kh in range(ksize) for kw in range(ksize)]
        patches = jnp.concatenate(parts, axis=-1)              # (1, TH, Wo, K*K*Cin)
        patches = patches.reshape(th * wo, ksize * ksize * cin)
        acc = jnp.dot(patches, w_ref[...], preferred_element_type=jnp.float32)

    conv_ref[...] = acc.reshape(1, th, wo, cp).astype(conv_ref.dtype)

    # BatchNorm partials for this tile (global reduction finished in the wrapper,
    # so batch statistics stay exact regardless of tiling).  When the last row
    # tile is ragged, mask the out-of-range rows out of the statistics.
    if ho_valid is not None:
        row_id = lax.broadcasted_iota(jnp.int32, (th, wo), 0) + r * th
        mask = (row_id < ho_valid).astype(jnp.float32).reshape(th * wo, 1)
        acc = acc * mask
    s = jnp.sum(acc, axis=0, keepdims=True)                    # (1, Cp)
    ss = jnp.sum(acc * acc, axis=0, keepdims=True)             # (1, Cp)
    pad = jnp.zeros((6, cp), jnp.float32)                      # sublane-dense store
    stats_ref[...] = jnp.concatenate([s, ss, pad], axis=0).reshape(1, 1, 8, cp)


def _bn_relu_kernel(conv_ref, scale_ref, shift_ref, o_ref):
    """Fused normalize + ReLU epilogue on a lane-dense (1, TH, Wo, Cp) tile."""
    y = conv_ref[...].astype(jnp.float32) * scale_ref[...] + shift_ref[...]
    o_ref[...] = jnp.maximum(y, 0.0).astype(o_ref.dtype)


def block_forward(x_nchw, w_oihw, gamma, beta, *, stride=1, padding=1, eps=1e-5,
                  row_tile=32):
    """PyTorch-semantics forward of Block (down=True, act=True), NCHW in/out."""
    N, Cin, H, W = x_nchw.shape
    Cout, _, K, _ = w_oihw.shape

    Ho = (H + 2 * padding - K) // stride + 1
    Wo = (W + 2 * padding - K) // stride + 1
    Cp = _round_up(Cout, 128)                      # lane-dense output channels

    th = _pick_row_tile(Ho, row_tile)
    R = pl.cdiv(Ho, th)
    Ho_pad = R * th

    compute_dtype = jnp.bfloat16                   # MXU operands / conv intermediate

    # --- wrapper glue: NCHW -> NHWC, reflect pad, weight -> (kh,kw,cin)xCp ------
    # TODO(synk): keep the whole model NHWC with Cp-padded channels end-to-end so
    # the per-layer transposes and the final channel slice disappear.
    x = jnp.transpose(x_nchw, (0, 2, 3, 1))
    x_pad = jnp.pad(x, ((0, 0), (padding, padding), (padding, padding), (0, 0)),
                    mode='reflect')
    Hp, Wp = x_pad.shape[1], x_pad.shape[2]
    rows_needed = (Ho_pad - 1) * stride + K        # keep ragged-tail reads in bounds
    if rows_needed > Hp:
        x_pad = jnp.pad(x_pad, ((0, 0), (0, rows_needed - Hp), (0, 0), (0, 0)))
        Hp = rows_needed
    x_pad = x_pad.astype(compute_dtype)

    w = jnp.transpose(w_oihw, (2, 3, 1, 0)).reshape(K * K * Cin, Cout)
    w = jnp.pad(w, ((0, 0), (0, Cp - Cout))).astype(compute_dtype)

    cparams = pltpu.CompilerParams(
        dimension_semantics=("parallel", "parallel"),
        vmem_limit_bytes=_vmem_limit_bytes())

    itemsize = jnp.dtype(compute_dtype).itemsize
    x_img_bytes = Hp * Wp * Cin * itemsize
    x_spec = _block_spec((1, Hp, Wp, Cin), lambda n, r: (n, 0, 0, 0),
                         single_buffer=x_img_bytes > (2 << 20))

    # --- kernel 1: conv (MXU matmuls) + per-tile BN partials ---------------------
    flops1 = 2 * N * Ho_pad * Wo * K * K * Cin * Cp
    bytes1 = (N * x_img_bytes + K * K * Cin * Cp * itemsize
              + N * Ho_pad * Wo * Cp * itemsize + N * R * 8 * Cp * 4)
    conv_p, stats = pl.pallas_call(
        functools.partial(_conv_stats_kernel, ksize=K, stride=stride,
                          ho_valid=(Ho if Ho_pad != Ho else None)),
        grid=(N, R),
        in_specs=[
            x_spec,                                             # resident per batch
            pl.BlockSpec((K * K * Cin, Cp), lambda n, r: (0, 0)),
        ],
        out_specs=(
            pl.BlockSpec((1, th, Wo, Cp), lambda n, r: (n, r, 0, 0)),
            pl.BlockSpec((1, 1, 8, Cp), lambda n, r: (n, r, 0, 0)),
        ),
        out_shape=(
            jax.ShapeDtypeStruct((N, Ho_pad, Wo, Cp), compute_dtype),
            jax.ShapeDtypeStruct((N, R, 8, Cp), jnp.float32),
        ),
        compiler_params=cparams,
        cost_estimate=pl.CostEstimate(flops=flops1, transcendentals=0,
                                      bytes_accessed=bytes1),
    )(x_pad, w)

    # --- finish the global BatchNorm reduction (tiny per-channel vectors) --------
    M = N * Ho * Wo
    sums = jnp.sum(stats, axis=(0, 1))                          # (8, Cp), f32
    mean = sums[0] / M
    var = jnp.maximum(sums[1] / M - mean * mean, 0.0)
    gamma_p = jnp.pad(gamma.astype(jnp.float32), (0, Cp - Cout), constant_values=1.0)
    beta_p = jnp.pad(beta.astype(jnp.float32), (0, Cp - Cout))
    scale = gamma_p * lax.rsqrt(var + eps)
    shift = beta_p - mean * scale
    # TODO(synk): running_mean / running_var buffers are not updated (pure forward).

    # --- kernel 2: normalize + ReLU over lane-dense tiles ------------------------
    out_dtype = x_nchw.dtype
    flops2 = 2 * N * Ho_pad * Wo * Cp
    bytes2 = (N * Ho_pad * Wo * Cp * (itemsize + jnp.dtype(out_dtype).itemsize)
              + 2 * Cp * 4)
    out_p = pl.pallas_call(
        _bn_relu_kernel,
        grid=(N, R),
        in_specs=[
            pl.BlockSpec((1, th, Wo, Cp), lambda n, r: (n, r, 0, 0)),
            pl.BlockSpec((1, Cp), lambda n, r: (0, 0)),
            pl.BlockSpec((1, Cp), lambda n, r: (0, 0)),
        ],
        out_specs=pl.BlockSpec((1, th, Wo, Cp), lambda n, r: (n, r, 0, 0)),
        out_shape=jax.ShapeDtypeStruct((N, Ho_pad, Wo, Cp), out_dtype),
        compiler_params=cparams,
        cost_estimate=pl.CostEstimate(flops=flops2, transcendentals=0,
                                      bytes_accessed=bytes2),
    )(conv_p, scale.reshape(1, Cp), shift.reshape(1, Cp))

    out = out_p[:, :Ho, :, :Cout]                               # drop row/channel pad
    return jnp.transpose(out, (0, 3, 1, 2))                     # back to NCHW


def _reference(x_nchw, w_oihw, gamma, beta, *, stride=1, padding=1, eps=1e-5):
    """Pure-JAX f32 reference (NCHW) mirroring PyTorch semantics."""
    x_pad = jnp.pad(x_nchw, ((0, 0), (0, 0), (padding, padding), (padding, padding)),
                    mode='reflect')
    conv = lax.conv_general_dilated(
        x_pad.astype(jnp.float32), w_oihw.astype(jnp.float32),
        window_strides=(stride, stride), padding='VALID',
        dimension_numbers=('NCHW', 'OIHW', 'NCHW'))
    mean = jnp.mean(conv, axis=(0, 2, 3), keepdims=True)
    var = jnp.mean((conv - mean) ** 2, axis=(0, 2, 3), keepdims=True)
    y = (conv - mean) * lax.rsqrt(var + eps)
    y = y * gamma[None, :, None, None] + beta[None, :, None, None]
    return jnp.maximum(y, 0.0).astype(x_nchw.dtype)


if __name__ == "__main__":
    key = jax.random.PRNGKey(0)

    def run_case(N, Cin, H, W, Cout, K, stride, padding, case_key):
        kx, kw, kg, kb = jax.random.split(case_key, 4)
        x = jax.random.normal(kx, (N, Cin, H, W), jnp.float32)
        w = jax.random.normal(kw, (Cout, Cin, K, K), jnp.float32) * 0.1
        gamma = 1.0 + 0.1 * jax.random.normal(kg, (Cout,), jnp.float32)
        beta = 0.1 * jax.random.normal(kb, (Cout,), jnp.float32)

        out = block_forward(x, w, gamma, beta, stride=stride, padding=padding)
        out = jax.block_until_ready(out)

        ref = _reference(x, w, gamma, beta, stride=stride, padding=padding)
        Ho = (H + 2 * padding - K) // stride + 1
        Wo = (W + 2 * padding - K) // stride + 1
        assert out.shape == (N, Cout, Ho, Wo), out.shape
        err = float(jnp.max(jnp.abs(out - ref)))
        # bf16 MXU operands / bf16 conv intermediate -> relaxed tolerance vs f32 ref.
        assert jnp.allclose(out, ref, atol=1e-1, rtol=1e-1), err
        return err

    # Case 1: first-layer-style shallow channels (deep-fold im2col path), stride 1.
    run_case(2, 4, 16, 16, 8, 3, 1, 1, jax.random.fold_in(key, 0))
    # Case 2: deep channels + stride 2 (per-tap MXU-accumulate path).
    run_case(2, 128, 16, 16, 8, 3, 2, 1, jax.random.fold_in(key, 1))

    print("KERNEL_OK")
</pallas_src>

<mosaic_0001>
module attributes {stable_mosaic.version = 11 : i64} {
  func.func @_conv_stats_kernel(%arg0: i32, %arg1: i32, %arg2: memref<1x18x18x4xbf16, #tpu.memory_space<vmem>>, %arg3: memref<36x128xbf16, #tpu.memory_space<vmem>>, %arg4: memref<1x16x16x128xbf16, #tpu.memory_space<vmem>>, %arg5: memref<1x1x8x128xf32, #tpu.memory_space<vmem>>) attributes {dimension_semantics = [#tpu.dimension_semantics<parallel>, #tpu.dimension_semantics<parallel>], iteration_bounds = array<i64: 2, 1>, scalar_prefetch = 0 : i64, scratch_operands = 0 : i64, tpu.core_type = #tpu.core_type<tc>, window_params = [{transform_indices = @transform_0, window_bounds = array<i64: 1, 18, 18, 4>}, {pipeline_mode = #tpu.pipeline_mode<synchronous>, transform_indices = @transform_1, window_bounds = array<i64: 36, 128>}, {transform_indices = @transform_2, window_bounds = array<i64: 1, 16, 16, 128>}, {transform_indices = @transform_3, window_bounds = array<i64: 1, 1, 8, 128>}]} {
    %c16_i32 = arith.constant 16 : i32
    %0 = arith.muli %arg1, %c16_i32 : i32
    %1 = tpu.assume_multiple %0, 16 : i32
    %c0 = arith.constant 0 : index
    %2 = arith.index_cast %1 : i32 to index
    %c0_0 = arith.constant 0 : index
    %c0_1 = arith.constant 0 : index
    %3 = vector.load %arg2[%c0, %2, %c0_0, %c0_1] : memref<1x18x18x4xbf16, #tpu.memory_space<vmem>>, vector<1x18x18x4xbf16>
    %4 = vector.extract_strided_slice %3 {offsets = [0, 0, 0, 0], sizes = [1, 16, 16, 4], strides = [1, 1, 1, 1]} : vector<1x18x18x4xbf16> to vector<1x16x16x4xbf16>
    %5 = vector.extract_strided_slice %3 {offsets = [0, 0, 1, 0], sizes = [1, 16, 16, 4], strides = [1, 1, 1, 1]} : vector<1x18x18x4xbf16> to vector<1x16x16x4xbf16>
    %6 = vector.extract_strided_slice %3 {offsets = [0, 0, 2, 0], sizes = [1, 16, 16, 4], strides = [1, 1, 1, 1]} : vector<1x18x18x4xbf16> to vector<1x16x16x4xbf16>
    %7 = vector.extract_strided_slice %3 {offsets = [0, 1, 0, 0], sizes = [1, 16, 16, 4], strides = [1, 1, 1, 1]} : vector<1x18x18x4xbf16> to vector<1x16x16x4xbf16>
    %8 = vector.extract_strided_slice %3 {offsets = [0, 1, 1, 0], sizes = [1, 16, 16, 4], strides = [1, 1, 1, 1]} : vector<1x18x18x4xbf16> to vector<1x16x16x4xbf16>
    %9 = vector.extract_strided_slice %3 {offsets = [0, 1, 2, 0], sizes = [1, 16, 16, 4], strides = [1, 1, 1, 1]} : vector<1x18x18x4xbf16> to vector<1x16x16x4xbf16>
    %10 = vector.extract_strided_slice %3 {offsets = [0, 2, 0, 0], sizes = [1, 16, 16, 4], strides = [1, 1, 1, 1]} : vector<1x18x18x4xbf16> to vector<1x16x16x4xbf16>
    %11 = vector.extract_strided_slice %3 {offsets = [0, 2, 1, 0], sizes = [1, 16, 16, 4], strides = [1, 1, 1, 1]} : vector<1x18x18x4xbf16> to vector<1x16x16x4xbf16>
    %12 = vector.extract_strided_slice %3 {offsets = [0, 2, 2, 0], sizes = [1, 16, 16, 4], strides = [1, 1, 1, 1]} : vector<1x18x18x4xbf16> to vector<1x16x16x4xbf16>
    %13 = tpu.concatenate %4, %5, %6, %7, %8, %9, %10, %11, %12 in 3 : vector<1x16x16x4xbf16>, vector<1x16x16x4xbf16>, vector<1x16x16x4xbf16>, vector<1x16x16x4xbf16>, vector<1x16x16x4xbf16>, vector<1x16x16x4xbf16>, vector<1x16x16x4xbf16>, vector<1x16x16x4xbf16>, vector<1x16x16x4xbf16> -> vector<1x16x16x36xbf16>
    %14 = vector.shape_cast %13 : vector<1x16x16x36xbf16> to vector<256x36xbf16>
    %c0_2 = arith.constant 0 : index
    %c0_3 = arith.constant 0 : index
    %15 = vector.load %arg3[%c0_2, %c0_3] : memref<36x128xbf16, #tpu.memory_space<vmem>>, vector<36x128xbf16>
    %cst = arith.constant dense<0.000000e+00> : vector<256x128xf32>
    %16 = tpu.matmul %14, %15, %cst {dimension_numbers = #tpu.dot_dimension_numbers<[1], [0], [0], [1], [0, 0, 1, 1], [], []>} : vector<256x36xbf16>, vector<36x128xbf16>, vector<256x128xf32> -> vector<256x128xf32>
    %17 = vector.shape_cast %16 : vector<256x128xf32> to vector<1x16x16x128xf32>
    %18 = arith.truncf %17 : vector<1x16x16x128xf32> to vector<1x16x16x128xbf16>
    %c0_4 = arith.constant 0 : index
    %c0_5 = arith.constant 0 : index
    %c0_6 = arith.constant 0 : index
    %c0_7 = arith.constant 0 : index
    %19 = vector.load %arg4[%c0_4, %c0_5, %c0_6, %c0_7] : memref<1x16x16x128xbf16, #tpu.memory_space<vmem>>, vector<1x16x16x128xbf16>
    tpu.vector_store %arg4[%c0_4, %c0_5, %c0_6, %c0_7], %18 {strides = array<i32>} : memref<1x16x16x128xbf16, #tpu.memory_space<vmem>>, vector<1x16x16x128xbf16>,
    %cst_8 = arith.constant dense<0.000000e+00> : vector<128xf32>
    %20 = vector.multi_reduction <add>, %16, %cst_8 [0] : vector<256x128xf32> to vector<128xf32>
    %21 = vector.shape_cast %20 : vector<128xf32> to vector<1x128xf32>
    %22 = arith.mulf %16, %16 : vector<256x128xf32>
    %cst_9 = arith.constant dense<0.000000e+00> : vector<128xf32>
    %23 = vector.multi_reduction <add>, %22, %cst_9 [0] : vector<256x128xf32> to vector<128xf32>
    %24 = vector.shape_cast %23 : vector<128xf32> to vector<1x128xf32>
    %cst_10 = arith.constant 0.000000e+00 : f32
    %25 = vector.broadcast %cst_10 : f32 to vector<6x128xf32>
    %26 = tpu.concatenate %21, %24, %25 in 0 : vector<1x128xf32>, vector<1x128xf32>, vector<6x128xf32> -> vector<8x128xf32>
    %27 = vector.shape_cast %26 : vector<8x128xf32> to vector<1x1x8x128xf32>
    %c0_11 = arith.constant 0 : index
    %c0_12 = arith.constant 0 : index
    %c0_13 = arith.constant 0 : index
    %c0_14 = arith.constant 0 : index
    %28 = vector.load %arg5[%c0_11, %c0_12, %c0_13, %c0_14] : memref<1x1x8x128xf32, #tpu.memory_space<vmem>>, vector<1x1x8x128xf32>
    tpu.vector_store %arg5[%c0_11, %c0_12, %c0_13, %c0_14], %27 {strides = array<i32>} : memref<1x1x8x128xf32, #tpu.memory_space<vmem>>, vector<1x1x8x128xf32>,
    return
  }
  func.func @transform_0(%arg0: i32, %arg1: i32) -> (i32, i32, i32, i32) {
    %c0_i32 = arith.constant 0 : i32
    %c0_i32_0 = arith.constant 0 : i32
    %c0_i32_1 = arith.constant 0 : i32
    %c0_i32_2 = arith.constant 0 : i32
    return %arg0, %c0_i32, %c0_i32_0, %c0_i32_1 : i32, i32, i32, i32
  }
  func.func @transform_1(%arg0: i32, %arg1: i32) -> (i32, i32) {
    %c0_i32 = arith.constant 0 : i32
    %c0_i32_0 = arith.constant 0 : i32
    %c0_i32_1 = arith.constant 0 : i32
    return %c0_i32, %c0_i32_0 : i32, i32
  }
  func.func @transform_2(%arg0: i32, %arg1: i32) -> (i32, i32, i32, i32) {
    %c0_i32 = arith.constant 0 : i32
    %c0_i32_0 = arith.constant 0 : i32
    %c0_i32_1 = arith.constant 0 : i32
    return %arg0, %arg1, %c0_i32, %c0_i32_0 : i32, i32, i32, i32
  }
  func.func @transform_3(%arg0: i32, %arg1: i32) -> (i32, i32, i32, i32) {
    %c0_i32 = arith.constant 0 : i32
    %c0_i32_0 = arith.constant 0 : i32
    %c0_i32_1 = arith.constant 0 : i32
    return %arg0, %arg1, %c0_i32, %c0_i32_0 : i32, i32, i32, i32
  }
}

</mosaic_0001>

<bundles_post_ra>
// kernel: tpu_custom_call.1
= control target key start
LH: loop header
LB: loop body
LE: loop exit
PB: predicated region body
PF: predicated region fallthrough
CT: control target
= control target key end

     0   :  { %9 = vsyncpa [#allocation3], 0  ;;  %s3019_s0 = inlined_call_operand.vmem [shape: bf16[2,18,18,4], index: 0, kind: input, shape index: {}]   ;;  %s3020_s1 = inlined_call_operand.vmem [shape: bf16[36,128], index: 1, kind: input, shape index: {}]   ;;  %s3021_s2 = inlined_call_operand.hbm [shape: bf16[2,16,16,128], index: 2, kind: output, shape index: {0}]   ;;  %s3022_s3 = inlined_call_operand.hbm [shape: f32[2,1,8,128], index: 3, kind: output, shape index: {1}]  }
   0x1   :  { %11 = vsyncpa [#allocation3 + $0x1], 0 }
   0x2   :  { %12 = vsyncpa [#allocation5], 0 }
   0x3   :  { %14 = vsyncpa [#allocation5 + $0x1], 0  ;;  %s2367_s12 = smov 0   ;;  %s2369_s13 = smov 0  }
   0x4   :  { %s2371_s14 = smov 0   ;;  %s2373_s15 = smov 0  }
   0x5   :  { %s2375_s16 = smov 0   ;;  %s2377_s17 = smov 0  }
   0x6 LB: > { %s1824_s18 = sadd.s32 4294967295, %s2334_s17   ;;  %s1825_s19 = sadd.s32 4294967294, %s2334_s17   ;;  %s2334_s17 = sphi %s2377_s17, %s20_s17   ;;  %s2330_s16 = sphi %s2375_s16, %s3029_s16   ;;  %s2326_s15 = sphi %s2373_s15, %s3028_s15   ;;  %s2322_s14 = sphi %s2371_s14, %s3027_s14   ;;  %s2318_s13 = sphi %s2369_s13, %s3026_s13   ;;  %s2314_s12 = sphi %s2367_s12, %s3025_s12  }
   0x7   : > { %s32_s20 = sadd.s32 1, %s2330_s16  ;;  %s88_s21 = sadd.s32 1, %s2322_s14 }
   0x8   : > { %p34_p0 = scmp.ge.s32.totalorder %s32_s20, 2  ;;  %p98_p1 = scmp.ne.s32.totalorder %s2322_s14, %s2318_s13 }
   0x9   : > { %p99_p2 = scmp.eq.s32.totalorder %s1824_s18, 1  ;;  %p104_p3 = scmp.ne.s32.totalorder %s2318_s13, %s2314_s12 }
   0xa   : > { %s3031_s20 = smov (%p34_p0, %s32_s20), 0  ;;  %p105_p5 = scmp.eq.s32.totalorder %s1825_s19, 1 }
   0xb   : > { %p2407_p4 = por %p99_p2, %p98_p1  ;;  %s83_s23 = ssub.s32 %s2330_s16, %s3031_s20 }
   0xc   : > { %p1828_p6 = scmp.ge.s32.totalorder %s2334_s17, 1  ;;  %p86_p7 = scmp.eq.s32.totalorder %s83_s23, 0 }
   0xd   : > { %p2414_p8 = por %p105_p5, %p104_p3  ;;  %p162_p9 = scmp.lt.s32.totalorder %s2334_s17, 3 }
   0xe   : > { %s2420_s25 = scalar_select %p86_p7, %s2322_s14, %s88_s21  }
   0xf   : > { %p163_p10 = pnand %p1828_p6, %p162_p9 }
  0x10   : > { %p191_p11 = scmp.lt.s32.totalorder (!%p163_p10), %s2326_s15, 1  ;;  %s2336_s4 = smov (!%p163_p10), 12  }
  0x11   : > { %166 = sbr.rel (%p163_p10) target bundleno = 641 (0x281), region = 28  ;;  %s2337_s5 = smov (!%p163_p10), 20  }
  0x12   : > { %s2338_s6 = smov (!%p163_p10), 8   ;;  %s2339_s7 = smov (!%p163_p10), 4  }
  0x13   : > { %s2340_s8 = smov (!%p163_p10), 16   ;;  %s2341_s9 = smov (!%p163_p10), 24  }
  0x14   : > { %s2342_s10 = smov (!%p163_p10), 28   ;;  %s2343_s23 = smov (!%p163_p10), 32  }
  0x15   : > { %s2896_s28 = sand.u32 (!%p163_p10), 1, %s2318_s13   ;;  %s2344_s18 = smov (!%p163_p10), [#allocation2]  }
  0x16   : > { %s192_s26 = scalar_select %p191_p11, %s2326_s15, 1  ;;  %vm609_vm0 = vcmask 1046528   ;;  %vm384_vm1 = vsmask.f32 7424  ;;  %v2211_v49 = vld [vmem:[%s3020_s1 + $0x8] sm:$0xff]   ;;  %vm1245_vm2 = vcmask 1041408  }
  0x17   : > { %v2209_v45 = vld [vmem:[%s3020_s1 + $0x10] ss:$0 sps:$4 sm:$0x33]   ;;  %v2213_v54 = vld [vmem:[%s3020_s1] sm:$0xff]   ;;  %vm928_vm3 = vcmask 31744   ;;  %vm961_vm4 = vcmask 64512  }
  0x18   : > { %s2119_s27 = smul.u32 216, %s192_s26  ;;  %2117 = vmatprep.subr.msk.bf16.mxu0 %vm1245_vm2, %v2209_v45  ;;  %v1247_v50 = vsel %vm1245_vm2, %v2209_v45, 0  ;;  %2118 = vmatprep.subr.msk.bf16.mxu1 %vm1245_vm2, %v2209_v45  ;;  %vm994_vm5 = vcmask 97280   ;;  %vm1027_vm6 = vcmask 130048   ;;  %vm1060_vm7 = vcmask 162816   ;;  %s1829_s29 = sshll.u32 %s2896_s28, 7 }
  0x19   : > { %2074 = vmatpush3.bf16.msra.mxu0 %v1247_v50  ;;  %2114 = vmatpush3.bf16.msra.mxu1 %v1247_v50  ;;  %vm1093_vm8 = vcmask 195584   ;;  %vm1126_vm9 = vcmask 228352   ;;  %vm1159_vm10 = vcmask 261120   ;;  %vm1212_vm11 = vcmask 293888   ;;  %s2232_s19 = sshll.u32 %s2344_s18, 4  ;;  %s2233_s19 = int_to_ptr.vmem [resolvable:$false] %s2232_s19 }
  0x1a   : > { %s2427_s30 = scalar_lea.vmem %s3019_s0, %s2119_s27  ;;  %2075 = vmatprep.subr.bf16.mxu0 %v2211_v49  ;;  %2112 = vmatprep.subr.bf16.mxu1 %v2211_v49  ;;  %s2234_s21 = scalar_lea.vmem %s2233_s19, 4096 }
  0x1b   : > { %v2430_v0 = vld [vmem:[%s2427_s30 + $0x18] sm:$0xff]   ;;  %v2433_v1 = vld [vmem:[%s2427_s30 + $0xc] sm:$0xff]   ;;  %v2191_v2 = vld [vmem:[%s2427_s30 + $0x14] ss:$0 sps:$4 sm:$0x11]  }
  0x1c   : > { %697 = vrot.lane.b32.xlu1 %v2430_v0, %s2336_s4  ;;  %v2439_v3 = vld [vmem:[%s2427_s30] sm:$0xff]   ;;  %695 = vrot.lane.b32.xlu0 %v2433_v1, %s2336_s4  ;;  %v613_v4 = vrot.slane %v2433_v1, 1  ;;  %v614_v5 = vrot.slane %v2191_v2, 1  ;;  %v2193_v6 = vld [vmem:[%s2427_s30 + $0x8] ss:$0 sps:$4 sm:$0x11]  }
  0x1d   : > { %v610_v7 = vrot.slane %v2439_v3, 1  ;;  %v386_v8 = vshrl.u32 %v2439_v3, 16  ;;  %v388_v9 = vshll.u32 %v2439_v3, 16  ;;  %v398_v10 = vshrl.u32 %v2433_v1, 16  ;;  %v2459_v30 = vld [vmem:[%s2427_s30 + $0x24] sm:$0xff]   ;;  %v2486_v48 = vld [vmem:[%s2427_s30 + $0x30] sm:$0xff]   ;;  %2076 = vmatpush3.bf16.msra.mxu0 %v2211_v49  ;;  %2115 = vmatpush3.bf16.msra.mxu1 %v2211_v49 }
  0x1e   : > { %v615_v11 = vsel %vm609_vm0, %v613_v4, %v614_v5  ;;  %v611_v12 = vrot.slane %v2193_v6, 1  ;;  %v393_v13 = vshll.u32 %v2193_v6, 16  ;;  %v2194_v14 = vld [vmem:[%s2427_s30 + $0x20] ss:$0 sps:$4 sm:$0x11]   ;;  %v400_v15 = vshll.u32 %v2433_v1, 16  ;;  %2077 = vmatprep.subr.bf16.mxu0 %v2213_v54  ;;  %2113 = vmatprep.subr.bf16.mxu1 %v2213_v54 }
  0x1f   : > { %v390_v16 = vrot.slane %v388_v9, 1  ;;  %v405_v17 = vshll.u32 %v2191_v2, 16  ;;  %v412_v18 = vshll.u32 %v2430_v0, 16  ;;  %v616_v23 = vrot.slane %v2430_v0, 1  ;;  %v2508_v60 = vld [vmem:[%s2427_s30 + $0x3c] sm:$0xff]   ;;  %v2584_v49 = vld [vmem:[%s2427_s30 + $0x6c] sm:$0xff]  }
  0x20   : > { %777 = vrot.lane.b32.xlu0 %v615_v11, %s2337_s5  ;;  %v612_v19 = vsel %vm609_vm0, %v610_v7, %v611_v12  ;;  %v395_v20 = vrot.slane %v393_v13, 1  ;;  %v402_v21 = vrot.slane %v400_v15, 1  ;;  %v410_v25 = vshrl.u32 %v2430_v0, 16  ;;  %v2196_v33 = vld [vmem:[%s2427_s30 + $0x2c] ss:$0 sps:$4 sm:$0x11]  }
  0x21   : > { %658 = vrot.lane.b32.xlu1 %v612_v19, %s2338_s6  ;;  %v391_v22 = vor.u32 %v390_v16, %v386_v8  ;;  %v407_v24 = vrot.slane %v405_v17, 1  ;;  %v617_v26 = vrot.slane %v2194_v14, 1  ;;  %v414_v28 = vrot.slane %v412_v18, 1  ;;  %v2198_v52 = vld [vmem:[%s2427_s30 + $0x38] ss:$0 sps:$4 sm:$0x11]   ;;  %2078 = vmatpush3.bf16.msra.mxu0 %v2213_v54 }
  0x22   : > { %v403_v27 = vor.u32 %v402_v21, %v398_v10  ;;  %v417_v29 = vshll.u32 %v2194_v14, 16  ;;  %v424_v37 = vshll.u32 %v2459_v30, 16  ;;  %v422_v39 = vshrl.u32 %v2459_v30, 16  ;;  %2116 = vmatpush3.bf16.msra.mxu1 %v2213_v54  ;;  %v2200_v2 = vld [vmem:[%s2427_s30 + $0x44] ss:$0 sps:$4 sm:$0x11]  }
  0x23   : > { %v396_v31 = vsel %vm384_vm1, %v391_v22, %v395_v20  ;;  %v618_v34 = vsel %vm609_vm0, %v616_v23, %v617_v26  ;;  %v415_v35 = vor.u32 %v414_v28, %v410_v25  ;;  %v429_v41 = vshll.u32 %v2196_v33, 16  ;;  %v2533_v14 = vld [vmem:[%s2427_s30 + $0x48] sm:$0xff]   ;;  %v2202_v16 = vld [vmem:[%s2427_s30 + $0x50] ss:$0 sps:$4 sm:$0x11]   ;;  %v2546_v23 = vld [vmem:[%s2427_s30 + $0x54] sm:$0xff]  }
  0x24   : > { %577 = vrot.lane.b32.xlu0 %v396_v31, %s2339_s7  ;;  %v408_v32 = vsel %vm384_vm1, %v403_v27, %v407_v24  ;;  %v419_v36 = vrot.slane %v417_v29, 1  ;;  %v426_v40 = vrot.slane %v424_v37, 1  ;;  %v619_v46 = vrot.slane %v2459_v30, 1  ;;  %v2204_v27 = vld [vmem:[%s2427_s30 + $0x5c] ss:$0 sps:$4 sm:$0x11]  }
  0x25   : > { %660 = vrot.lane.b32.xlu1 %v615_v11, %s2338_s6  ;;  %v431_v43 = vrot.slane %v429_v41, 1  ;;  %v620_v47 = vrot.slane %v2196_v33, 1  ;;  %v436_v53 = vshll.u32 %v2486_v48, 16  ;;  %v434_v55 = vshrl.u32 %v2486_v48, 16 }
  0x26   : > { %v420_v38 = vsel %vm384_vm1, %v415_v35, %v419_v36  ;;  %v427_v42 = vor.u32 %v426_v40, %v422_v39  ;;  %v441_v57 = vshll.u32 %v2198_v52, 16  ;;  %v622_v62 = vrot.slane %v2486_v48, 1  ;;  %v2571_v39 = vld [vmem:[%s2427_s30 + $0x60] sm:$0xff]   ;;  %v2206_v41 = vld [vmem:[%s2427_s30 + $0x68] ss:$0 sps:$4 sm:$0x11]  }
  0x27   : > { %v621_v51 = vsel %vm609_vm0, %v619_v46, %v620_v47  ;;  %v438_v56 = vrot.slane %v436_v53, 1  ;;  %v623_v63 = vrot.slane %v2198_v52, 1  ;;  %v448_v4 = vshll.u32 %v2508_v60, 16  ;;  %v2208_v53 = vld [vmem:[%s2427_s30 + $0x74] ss:$0 sps:$4 sm:$0x11]  }
  0x28   : > { %579 = vrot.lane.b32.xlu0 %v408_v32, %s2339_s7  ;;  %v432_v44 = vsel %vm384_vm1, %v427_v42, %v431_v43  ;;  %v443_v59 = vrot.slane %v441_v57, 1  ;;  %v446_v6 = vshrl.u32 %v2508_v60, 16  ;;  %v453_v8 = vshll.u32 %v2200_v2, 16 }
  0x29   : > { %779 = vrot.lane.b32.xlu1 %v618_v34, %s2337_s5  ;;  %v439_v58 = vor.u32 %v438_v56, %v434_v55  ;;  %v624_v5 = vsel %vm609_vm0, %v622_v62, %v623_v63  ;;  %v450_v7 = vrot.slane %v448_v4, 1  ;;  %v625_v12 = vrot.slane %v2508_v60, 1 }
  0x2a   : > { %v455_v10 = vrot.slane %v453_v8, 1  ;;  %v626_v13 = vrot.slane %v2200_v2, 1  ;;  %v460_v17 = vshll.u32 %v2533_v14, 16  ;;  %v458_v18 = vshrl.u32 %v2533_v14, 16 }
  0x2b   : > { %v444_v61 = vsel %vm384_vm1, %v439_v58, %v443_v59  ;;  %v451_v9 = vor.u32 %v450_v7, %v446_v6  ;;  %v465_v20 = vshll.u32 %v2202_v16, 16  ;;  %v628_v25 = vrot.slane %v2533_v14, 1 }
  0x2c   : > { %742 = vrot.lane.b32.xlu0 %v408_v32, %s2340_s8  ;;  %v627_v15 = vsel %vm609_vm0, %v625_v12, %v626_v13  ;;  %v462_v19 = vrot.slane %v460_v17, 1  ;;  %v629_v26 = vrot.slane %v2202_v16, 1  ;;  %v472_v28 = vshll.u32 %v2546_v23, 16  ;;  %v2212_v13 = vld [vmem:[%s2427_s30 + $0x80] ss:$0 sps:$4 sm:$0x11]  }
  0x2d   : > { %744 = vrot.lane.b32.xlu1 %v420_v38, %s2340_s8  ;;  %v456_v11 = vsel %vm384_vm1, %v451_v9, %v455_v10  ;;  %v467_v22 = vrot.slane %v465_v20, 1  ;;  %v470_v31 = vshrl.u32 %v2546_v23, 16  ;;  %v477_v33 = vshll.u32 %v2204_v27, 16  ;;  %v2609_v9 = vld [vmem:[%s2427_s30 + $0x78] sm:$0xff]  }
  0x2e   : > { %v463_v21 = vor.u32 %v462_v19, %v458_v18  ;;  %v630_v29 = vsel %vm609_vm0, %v628_v25, %v629_v26  ;;  %v474_v32 = vrot.slane %v472_v28, 1  ;;  %v631_v37 = vrot.slane %v2546_v23, 1  ;;  %v2627_v28 = vld [vmem:[%s2427_s30 + $0x84] sm:$0xff]  }
  0x2f   : > { %v479_v35 = vrot.slane %v477_v33, 1  ;;  %v484_v42 = vshll.u32 %v2571_v39, 16  ;;  %v482_v43 = vshrl.u32 %v2571_v39, 16  ;;  %v489_v45 = vshll.u32 %v2206_v41, 16 }
  0x30   : > { %814 = vrot.lane.b32.xlu0 %v2430_v0, %s2341_s9  ;;  %v468_v24 = vsel %vm384_vm1, %v463_v21, %v467_v22  ;;  %v635_v52 = vrot.slane %v2206_v41, 1  ;;  %v496_v54 = vshll.u32 %v2584_v49, 16  ;;  %v494_v56 = vshrl.u32 %v2584_v49, 16 }
  0x31   : > { %816 = vrot.lane.b32.xlu1 %v2459_v30, %s2341_s9  ;;  %v491_v47 = vrot.slane %v489_v45, 1  ;;  %v501_v58 = vshll.u32 %v2208_v53, 16  ;;  %v637_v6 = vrot.slane %v2584_v49, 1  ;;  %v638_v7 = vrot.slane %v2208_v53, 1 }
  0x32   : > { %v498_v57 = vrot.slane %v496_v54, 1  ;;  %v506_v19 = vshrl.u32 %v2609_v9, 16  ;;  %v513_v21 = vshll.u32 %v2212_v13, 16  ;;  %v640_v33 = vrot.slane %v2609_v9, 1 }
  0x33   : > { %v503_v63 = vrot.slane %v501_v58, 1  ;;  %v518_v45 = vshrl.u32 %v2627_v28, 16 }
  0x34   : > { %861 = vrot.lane.b32.xlu0 %v420_v38, %s2342_s10  ;;  %v499_v62 = vor.u32 %v498_v57, %v494_v56 }
  0x35   : > { %863 = vrot.lane.b32.xlu1 %v432_v44, %s2342_s10 }
  0x36   : > { %v504_v4 = vsel %vm384_vm1, %v499_v62, %v503_v63 }
  0x38   : > { %896 = vrot.lane.b32.xlu0 %v618_v34, %s2343_s23 }
  0x39   : > { %581 = vrot.lane.b32.xlu1 %v420_v38, %s2339_s7  ;;  %v632_v38 = vrot.slane %v2204_v27, 1 }
  0x3b   : > { %v633_v40 = vsel %vm609_vm0, %v631_v37, %v632_v38  ;;  %v641_v37 = vrot.slane %v2212_v13, 1  ;;  %v2215_v38 = vld [vmem:[%s2427_s30 + $0x8c] ss:$0 sps:$4 sm:$0x11]  }
  0x3c   : > { %898 = vrot.lane.b32.xlu0 %v621_v51, %s2343_s23 }
  0x3d   : > { %583 = vrot.lane.b32.xlu1 %v432_v44, %s2339_s7 }
  0x40   : > { %662 = vrot.lane.b32.xlu0 %v618_v34, %s2338_s6  ;;  %v475_v34 = vor.u32 %v474_v32, %v470_v31 }
  0x41   : > { %664 = vrot.lane.b32.xlu1 %v621_v51, %s2338_s6 }
  0x42   : > { %v480_v36 = vsel %vm384_vm1, %v475_v34, %v479_v35 }
  0x44   : > { %699 = vrot.lane.b32.xlu0 %v2459_v30, %s2336_s4 }
  0x45   : > { %701 = vrot.lane.b32.xlu1 %v2486_v48, %s2336_s4 }
  0x48   : > { %746 = vrot.lane.b32.xlu0 %v432_v44, %s2340_s8  ;;  %v486_v44 = vrot.slane %v484_v42, 1 }
  0x49   : > { %748 = vrot.lane.b32.xlu1 %v444_v61, %s2340_s8 }
  0x4a   : > { %v487_v46 = vor.u32 %v486_v44, %v482_v43 }
  0x4c   : > { %781 = vrot.lane.b32.xlu0 %v621_v51, %s2337_s5  ;;  %v492_v50 = vsel %vm384_vm1, %v487_v46, %v491_v47  ;;  %v634_v51 = vrot.slane %v2571_v39, 1 }
  0x4d   : > { %783 = vrot.lane.b32.xlu1 %v624_v5, %s2337_s5 }
  0x4e   : > { %v636_v55 = vsel %vm609_vm0, %v634_v51, %v635_v52  ;;  %v525_v52 = vshll.u32 %v2215_v38, 16 }
  0x50   : > { %818 = vrot.lane.b32.xlu0 %v2486_v48, %s2341_s9 }
  0x51   : > { %820 = vrot.lane.b32.xlu1 %v2508_v60, %s2341_s9 }
  0x54   : > { %865 = vrot.lane.b32.xlu0 %v444_v61, %s2342_s10 }
  0x55   : > { %867 = vrot.lane.b32.xlu1 %v456_v11, %s2342_s10 }
  0x58   : > { %900 = vrot.lane.b32.xlu0 %v624_v5, %s2343_s23 }
  0x59   : > { %585 = vrot.lane.b32.xlu1 %v444_v61, %s2339_s7 }
  0x5c   : > { %902 = vrot.lane.b32.xlu0 %v627_v15, %s2343_s23 }
  0x5d   : > { %587 = vrot.lane.b32.xlu1 %v456_v11, %s2339_s7 }
  0x60   : > { %666 = vrot.lane.b32.xlu0 %v624_v5, %s2338_s6 }
  0x61   : > { %668 = vrot.lane.b32.xlu1 %v627_v15, %s2338_s6 }
  0x64   : > { %703 = vrot.lane.b32.xlu0 %v2508_v60, %s2336_s4 }
  0x65   : > { %705 = vrot.lane.b32.xlu1 %v2533_v14, %s2336_s4 }
  0x68   : > { %750 = vrot.lane.b32.xlu0 %v456_v11, %s2340_s8  ;;  %v639_v11 = vsel %vm609_vm0, %v637_v6, %v638_v7  ;;  %v643_v6 = vrot.slane %v2627_v28, 1  ;;  %v644_v7 = vrot.slane %v2215_v38, 1 }
  0x69   : > { %752 = vrot.lane.b32.xlu1 %v468_v24, %s2340_s8 }
  0x6c   : > { %785 = vrot.lane.b32.xlu0 %v627_v15, %s2337_s5  ;;  %v508_v15 = vshll.u32 %v2609_v9, 16 }
  0x6d   : > { %787 = vrot.lane.b32.xlu1 %v630_v29, %s2337_s5 }
  0x6e   : > { %v510_v20 = vrot.slane %v508_v15, 1  ;;  %v2217_v15 = vld [vmem:[%s2427_s30 + $0x98] ss:$0 sps:$4 sm:$0x11]  }
  0x70   : > { %822 = vrot.lane.b32.xlu0 %v2533_v14, %s2341_s9  ;;  %v511_v27 = vor.u32 %v510_v20, %v506_v19 }
  0x71   : > { %824 = vrot.lane.b32.xlu1 %v2546_v23, %s2341_s9 }
  0x74   : > { %869 = vrot.lane.b32.xlu0 %v468_v24, %s2342_s10 }
  0x75   : > { %871 = vrot.lane.b32.xlu1 %v480_v36, %s2342_s10 }
  0x78   : > { %904 = vrot.lane.b32.xlu0 %v630_v29, %s2343_s23 }
  0x79   : > { %589 = vrot.lane.b32.xlu1 %v468_v24, %s2339_s7 }
  0x7c   : > { %906 = vrot.lane.b32.xlu0 %v633_v40, %s2343_s23 }
  0x7d   : > { %591 = vrot.lane.b32.xlu1 %v480_v36, %s2339_s7 }
  0x80   : > { %670 = vrot.lane.b32.xlu0 %v630_v29, %s2338_s6 }
  0x81   : > { %672 = vrot.lane.b32.xlu1 %v633_v40, %s2338_s6 }
  0x84   : > { %707 = vrot.lane.b32.xlu0 %v2546_v23, %s2336_s4 }
  0x85   : > { %709 = vrot.lane.b32.xlu1 %v2571_v39, %s2336_s4 }
  0x88   : > { %754 = vrot.lane.b32.xlu0 %v480_v36, %s2340_s8 }
  0x89   : > { %756 = vrot.lane.b32.xlu1 %v492_v50, %s2340_s8 }
  0x8c   : > { %789 = vrot.lane.b32.xlu0 %v633_v40, %s2337_s5  ;;  %v520_v40 = vshll.u32 %v2627_v28, 16 }
  0x8d   : > { %791 = vrot.lane.b32.xlu1 %v636_v55, %s2337_s5 }
  0x8e   : > { %v698_v59 = vpop.permute.xlu1 %697  ;;  %v696_v61 = vpop.permute.xlu0 %695  ;;  %v522_v51 = vrot.slane %v520_v40, 1 }
  0x90   : > { %826 = vrot.lane.b32.xlu0 %v2571_v39, %s2341_s9 }
  0x91   : > { %828 = vrot.lane.b32.xlu1 %v2584_v49, %s2341_s9 }
  0x92   : > { %v778_v2 = vpop.permute.xlu0 %777 }
  0x93   : > { %v659_v5 = vpop.permute.xlu1 %658 }
  0x94   : > { %873 = vrot.lane.b32.xlu0 %v492_v50, %s2342_s10 }
  0x95   : > { %875 = vrot.lane.b32.xlu1 %v504_v4, %s2342_s10 }
  0x96   : > { %v578_v8 = vpop.permute.xlu0 %577 }
  0x97   : > { %v661_v10 = vpop.permute.xlu1 %660  ;;  %v930_v17 = vsel %vm928_vm3, %v2439_v3, %v578_v8  ;;  %v515_v3 = vrot.slane %v513_v21, 1  ;;  %v537_v21 = vshll.u32 %v2217_v15, 16 }
  0x98   : > { %908 = vrot.lane.b32.xlu0 %v636_v55, %s2343_s23  ;;  %v963_v25 = vsel %vm961_vm4, %v930_v17, %v659_v5 }
  0x99   : > { %593 = vrot.lane.b32.xlu1 %v492_v50, %s2339_s7  ;;  %v996_v32 = vsel %vm994_vm5, %v963_v25, %v696_v61  ;;  %v516_v36 = vsel %vm384_vm1, %v511_v27, %v515_v3  ;;  %v642_v50 = vsel %vm609_vm0, %v640_v33, %v641_v37  ;;  %v527_v61 = vrot.slane %v525_v52, 1  ;;  %v2680_v27 = vld [vmem:[%s2427_s30 + $0x9c] sm:$0xff]  }
  0x9a   : > { %v580_v12 = vpop.permute.xlu0 %579  ;;  %v544_v37 = vshll.u32 %v2680_v27, 16 }
  0x9b   : > { %v780_v16 = vpop.permute.xlu1 %779  ;;  %v932_v24 = vsel %vm928_vm3, %v2433_v1, %v580_v12  ;;  %v645_v12 = vsel %vm609_vm0, %v643_v6, %v644_v7  ;;  %v649_v6 = vrot.slane %v2680_v27, 1 }
  0x9c   : > { %910 = vrot.lane.b32.xlu0 %v639_v11, %s2343_s23  ;;  %v965_v29 = vsel %vm961_vm4, %v932_v24, %v661_v10  ;;  %v2667_v10 = vld [vmem:[%s2427_s30 + $0x90] sm:$0xff]  }
  0x9d   : > { %595 = vrot.lane.b32.xlu1 %v504_v4, %s2339_s7  ;;  %v998_v34 = vsel %vm994_vm5, %v965_v29, %v698_v59  ;;  %v523_v59 = vor.u32 %v522_v51, %v518_v45  ;;  %v530_v19 = vshrl.u32 %v2667_v10, 16  ;;  %v542_v45 = vshrl.u32 %v2680_v27, 16 }
  0x9e   : > { %v743_v18 = vpop.permute.xlu0 %742 }
  0x9f   : > { %v745_v22 = vpop.permute.xlu1 %744  ;;  %v1029_v1 = vsel %vm1027_vm6, %v996_v32, %v743_v18  ;;  %v646_v32 = vrot.slane %v2667_v10, 1 }
  0xa0   : > { %674 = vrot.lane.b32.xlu0 %v636_v55, %s2338_s6  ;;  %v1062_v42 = vsel %vm1060_vm7, %v1029_v1, %v778_v2  ;;  %v1031_v43 = vsel %vm1027_vm6, %v998_v34, %v745_v22  ;;  %v647_v1 = vrot.slane %v2217_v15, 1 }
  0xa1   : > { %676 = vrot.lane.b32.xlu1 %v639_v11, %s2338_s6  ;;  %v1064_v55 = vsel %vm1060_vm7, %v1031_v43, %v780_v16  ;;  %v532_v16 = vshll.u32 %v2667_v10, 16 }
  0xa2   : > { %v815_v26 = vpop.permute.xlu0 %814 }
  0xa3   : > { %v817_v31 = vpop.permute.xlu1 %816  ;;  %v1095_v44 = vsel %vm1093_vm8, %v1062_v42, %v815_v26  ;;  %v534_v20 = vrot.slane %v532_v16, 1  ;;  %v539_v26 = vrot.slane %v537_v21, 1  ;;  %v2221_v16 = vld [vmem:[%s2427_s30 + $0xb0] ss:$0 sps:$4 sm:$0x11]  }
  0xa4   : > { %711 = vrot.lane.b32.xlu0 %v2584_v49, %s2336_s4  ;;  %v1097_v56 = vsel %vm1093_vm8, %v1064_v55, %v817_v31 }
  0xa5   : > { %713 = vrot.lane.b32.xlu1 %v2609_v9, %s2336_s4  ;;  %v535_v25 = vor.u32 %v534_v20, %v530_v19 }
  0xa6   : > { %v862_v35 = vpop.permute.xlu0 %861 }
  0xa7   : > { %v864_v41 = vpop.permute.xlu1 %863  ;;  %v1128_v46 = vsel %vm1126_vm9, %v1095_v44, %v862_v35  ;;  %v540_v35 = vsel %vm384_vm1, %v535_v25, %v539_v26  ;;  %v648_v44 = vsel %vm609_vm0, %v646_v32, %v647_v1 }
  0xa8   : > { %758 = vrot.lane.b32.xlu0 %v504_v4, %s2340_s8  ;;  %v1130_v57 = vsel %vm1126_vm9, %v1097_v56, %v864_v41  ;;  %v528_v4 = vsel %vm384_vm1, %v523_v59, %v527_v61 }
  0xa9   : > { %760 = vrot.lane.b32.xlu1 %v516_v36, %s2340_s8 }
  0xaa   : > { %v897_v47 = vpop.permute.xlu0 %896 }
  0xab   : > { %v582_v53 = vpop.permute.xlu1 %581  ;;  %v1161_v54 = vsel %vm1159_vm10, %v1128_v46, %v897_v47 }
  0xac   : > { %793 = vrot.lane.b32.xlu0 %v639_v11, %s2337_s5  ;;  %2079 = vmatprep.mubr.msk.bf16.mxu0 %vm1212_vm11, %v1161_v54  ;;  %v934_v29 = vsel %vm928_vm3, %v2430_v0, %v582_v53 }
  0xad   : > { %795 = vrot.lane.b32.xlu1 %v642_v50, %s2337_s5 }
  0xae   : > { %v899_v58 = vpop.permute.xlu0 %898 }
  0xaf   : > { %v584_v62 = vpop.permute.xlu1 %583  ;;  %v1163_v63 = vsel %vm1159_vm10, %v1130_v57, %v899_v58 }
  0xb0   : > { %830 = vrot.lane.b32.xlu0 %v2609_v9, %s2341_s9  ;;  %2080 = vmatmul.mubr.msk.bf16.vlgmr.msra.gmra.mxu0 %vm1212_vm11, %v1163_v63  ;;  %v936_v40 = vsel %vm928_vm3, %v2459_v30, %v584_v62  ;;  %v546_v30 = vrot.slane %v544_v37, 1 }
  0xb1   : > { %832 = vrot.lane.b32.xlu1 %v2627_v28, %s2341_s9 }
  0xb2   : > { %v663_v2 = vpop.permute.xlu0 %662  ;;  %v547_v59 = vor.u32 %v546_v30, %v542_v45 }
  0xb3   : > { %v665_v5 = vpop.permute.xlu1 %664  ;;  %v967_v31 = vsel %vm961_vm4, %v934_v29, %v663_v2  ;;  %v2738_v29 = vld [vmem:[%s2427_s30 + $0xb4] sm:$0xff]  }
  0xb4   : > { %877 = vrot.lane.b32.xlu0 %v516_v36, %s2342_s10  ;;  %v969_v42 = vsel %vm961_vm4, %v936_v40, %v665_v5 }
  0xb5   : > { %879 = vrot.lane.b32.xlu1 %v528_v4, %s2342_s10 }
  0xb6   : > { %v700_v8 = vpop.permute.xlu0 %699 }
  0xb7   : > { %v702_v11 = vpop.permute.xlu1 %701  ;;  %v1000_v33 = vsel %vm994_vm5, %v967_v31, %v700_v8 }
  0xb8   : > { %912 = vrot.lane.b32.xlu0 %v642_v50, %s2343_s23  ;;  %v1002_v46 = vsel %vm994_vm5, %v969_v42, %v702_v11  ;;  %v2725_v11 = vld [vmem:[%s2427_s30 + $0xa8] sm:$0xff]  }
  0xb9   : > { %597 = vrot.lane.b32.xlu1 %v516_v36, %s2339_s7  ;;  %v2219_v36 = vld [vmem:[%s2427_s30 + $0xa4] ss:$0 sps:$4 sm:$0x11]   ;;  %v554_v20 = vshrl.u32 %v2725_v11, 16 }
  0xba   : > { %v747_v13 = vpop.permute.xlu0 %746  ;;  %v549_v51 = vshll.u32 %v2219_v36, 16  ;;  %v650_v7 = vrot.slane %v2219_v36, 1 }
  0xbb   : > { %v749_v17 = vpop.permute.xlu1 %748  ;;  %v1033_v0 = vsel %vm1027_vm6, %v1000_v33, %v747_v13  ;;  %v652_v33 = vrot.slane %v2725_v11, 1 }
  0xbc   : > { %914 = vrot.lane.b32.xlu0 %v645_v12, %s2343_s23  ;;  %v1035_v52 = vsel %vm1027_vm6, %v1002_v46, %v749_v17  ;;  %v551_v61 = vrot.slane %v549_v51, 1  ;;  %v651_v13 = vsel %vm609_vm0, %v649_v6, %v650_v7  ;;  %v556_v17 = vshll.u32 %v2725_v11, 16 }
  0xbd   : > { %599 = vrot.lane.b32.xlu1 %v528_v4, %s2339_s7  ;;  %v566_v46 = vshrl.u32 %v2738_v29, 16  ;;  %v655_v6 = vrot.slane %v2738_v29, 1 }
  0xbe   : > { %v782_v18 = vpop.permute.xlu0 %781  ;;  %v558_v21 = vrot.slane %v556_v17, 1  ;;  %v2225_v17 = vld [vmem:[%s2427_s30 + $0xc8] ss:$0 sps:$4 sm:$0x11]  }
  0xbf   : > { %v784_v22 = vpop.permute.xlu1 %783  ;;  %v1066_v41 = vsel %vm1060_vm7, %v1033_v0, %v782_v18  ;;  %v2223_v0 = vld [vmem:[%s2427_s30 + $0xbc] ss:$0 sps:$4 sm:$0x11]  }
  0xc0   : > { %678 = vrot.lane.b32.xlu0 %v642_v50, %s2338_s6  ;;  %v1068_v55 = vsel %vm1060_vm7, %v1035_v52, %v784_v22  ;;  %v561_v22 = vshll.u32 %v2221_v16, 16  ;;  %v559_v26 = vor.u32 %v558_v21, %v554_v20  ;;  %v573_v51 = vshll.u32 %v2223_v0, 16 }
  0xc1   : > { %680 = vrot.lane.b32.xlu1 %v645_v12, %s2338_s6  ;;  %v656_v7 = vrot.slane %v2223_v0, 1 }
  0xc2   : > { %v819_v24 = vpop.permute.xlu0 %818 }
  0xc3   : > { %v821_v3 = vpop.permute.xlu1 %820  ;;  %v1099_v43 = vsel %vm1093_vm8, %v1066_v41, %v819_v24 }
  0xc4   : > { %715 = vrot.lane.b32.xlu0 %v2627_v28, %s2336_s4  ;;  %v1101_v56 = vsel %vm1093_vm8, %v1068_v55, %v821_v3  ;;  %v563_v3 = vrot.slane %v561_v22, 1 }
  0xc5   : > { %717 = vrot.lane.b32.xlu1 %v2667_v10, %s2336_s4 }
  0xc6   : > { %v866_v34 = vpop.permute.xlu0 %865  ;;  %v564_v37 = vsel %vm384_vm1, %v559_v26, %v563_v3 }
  0xc7   : > { %v868_v38 = vpop.permute.xlu1 %867  ;;  %v1132_v47 = vsel %vm1126_vm9, %v1099_v43, %v866_v34  ;;  %v653_v34 = vrot.slane %v2221_v16, 1 }
  0xc8   : > { %762 = vrot.lane.b32.xlu0 %v528_v4, %s2340_s8  ;;  %v1134_v57 = vsel %vm1126_vm9, %v1101_v56, %v868_v38  ;;  %v552_v4 = vsel %vm384_vm1, %v547_v59, %v551_v61  ;;  %v568_v38 = vshll.u32 %v2738_v29, 16  ;;  %v575_v61 = vrot.slane %v573_v51, 1 }
  0xc9   : > { %764 = vrot.lane.b32.xlu1 %v540_v35, %s2340_s8  ;;  %v654_v45 = vsel %vm609_vm0, %v652_v33, %v653_v34 }
  0xca   : > { %v901_v50 = vpop.permute.xlu0 %900 }
  0xcb   : > { %v586_v53 = vpop.permute.xlu1 %585  ;;  %v1165_v54 = vsel %vm1159_vm10, %v1132_v47, %v901_v50 }
  0xcc   : > { %797 = vrot.lane.b32.xlu0 %v645_v12, %s2337_s5  ;;  %2083 = vmatprep.mubr.msk.bf16.mxu0 %vm1212_vm11, %v1165_v54  ;;  %v938_v32 = vsel %vm928_vm3, %v2486_v48, %v586_v53 }
  0xcd   : > { %799 = vrot.lane.b32.xlu1 %v648_v44, %s2337_s5 }
  0xce   : > { %v903_v58 = vpop.permute.xlu0 %902 }
  0xcf   : > { %v588_v62 = vpop.permute.xlu1 %587  ;;  %v1167_v63 = vsel %vm1159_vm10, %v1134_v57, %v903_v58 }
  0xd0   : > { %834 = vrot.lane.b32.xlu0 %v2667_v10, %s2341_s9  ;;  %2084 = vmatmul.mubr.msk.bf16.gmra.mxu0 %vm1212_vm11, %v1167_v63  ;;  %v940_v41 = vsel %vm928_vm3, %v2508_v60, %v588_v62  ;;  %v570_v60 = vrot.slane %v568_v38, 1 }
  0xd1   : > { %836 = vrot.lane.b32.xlu1 %v2680_v27, %s2341_s9 }
  0xd2   : > { %v667_v2 = vpop.permute.xlu0 %666  ;;  %v571_v59 = vor.u32 %v570_v60, %v566_v46 }
  0xd3   : > { %v669_v5 = vpop.permute.xlu1 %668  ;;  %v971_v1 = vsel %vm961_vm4, %v938_v32, %v667_v2  ;;  %v2226_v32 = vld [vmem:[%s2427_s30 + $0xcc] sm:$0xff]  }
  0xd4   : > { %881 = vrot.lane.b32.xlu0 %v540_v35, %s2342_s10  ;;  %v973_v43 = vsel %vm961_vm4, %v940_v41, %v669_v5 }
  0xd5   : > { %883 = vrot.lane.b32.xlu1 %v552_v4, %s2342_s10 }
  0xd6   : > { %v704_v8 = vpop.permute.xlu0 %703 }
  0xd7   : > { %v706_v12 = vpop.permute.xlu1 %705 }
  0xd8   : > { %916 = vrot.lane.b32.xlu0 %v648_v44, %s2343_s23  ;;  %v1006_v47 = vsel %vm994_vm5, %v973_v43, %v706_v12  ;;  %v2783_v12 = vld [vmem:[%s2427_s30 + $0xc0] sm:$0xff]  }
  0xd9   : > { %601 = vrot.lane.b32.xlu1 %v540_v35, %s2339_s7  ;;  %v1004_v35 = vsel %vm994_vm5, %v971_v1, %v704_v8  ;;  %v731_v21 = vshrl.u32 %v2783_v12, 16 }
  0xda   : > { %v751_v15 = vpop.permute.xlu0 %750 }
  0xdb   : > { %v753_v18 = vpop.permute.xlu1 %752  ;;  %v1037_v48 = vsel %vm1027_vm6, %v1004_v35, %v751_v15  ;;  %v657_v15 = vsel %vm609_vm0, %v655_v6, %v656_v7  ;;  %v774_v35 = vrot.slane %v2783_v12, 1 }
  0xdc   : > { %918 = vrot.lane.b32.xlu0 %v651_v13, %s2343_s23  ;;  %v1039_v52 = vsel %vm1027_vm6, %v1006_v47, %v753_v18  ;;  %v733_v18 = vshll.u32 %v2783_v12, 16  ;;  %v850_v47 = vshrl.u32 %v2226_v32, 16 }
  0xdd   : > { %603 = vrot.lane.b32.xlu1 %v552_v4, %s2339_s7 }
  0xde   : > { %v786_v19 = vpop.permute.xlu0 %785  ;;  %v735_v22 = vrot.slane %v733_v18, 1 }
  0xdf   : > { %v788_v24 = vpop.permute.xlu1 %787  ;;  %v1070_v42 = vsel %vm1060_vm7, %v1037_v48, %v786_v19  ;;  %v2227_v48 = vld [vmem:[%s2427_s30 + $0xd4] ss:$0 sps:$4 sm:$0x11]   ;;  %s2901_s30 = scalar_lea.vmem [#allocation2], %s1829_s29 }
  0xe0   : > { %682 = vrot.lane.b32.xlu0 %v648_v44, %s2338_s6  ;;  %v1072_v55 = vsel %vm1060_vm7, %v1039_v52, %v788_v24  ;;  %v738_v24 = vshll.u32 %v2225_v17, 16  ;;  %v736_v3 = vor.u32 %v735_v22, %v731_v21  ;;  %v894_v6 = vrot.slane %v2227_v48, 1 }
  0xe1   : > { %684 = vrot.lane.b32.xlu1 %v651_v13, %s2338_s6 }
  0xe2   : > { %v823_v25 = vpop.permute.xlu0 %822 }
  0xe3   : > { %v825_v31 = vpop.permute.xlu1 %824  ;;  %v1103_v44 = vsel %vm1093_vm8, %v1070_v42, %v823_v25 }
  0xe4   : > { %719 = vrot.lane.b32.xlu0 %v2680_v27, %s2336_s4  ;;  %v1105_v56 = vsel %vm1093_vm8, %v1072_v55, %v825_v31  ;;  %v740_v31 = vrot.slane %v738_v24, 1 }
  0xe5   : > { %721 = vrot.lane.b32.xlu1 %v2725_v11, %s2336_s4 }
  0xe6   : > { %v870_v36 = vpop.permute.xlu0 %869  ;;  %v741_v38 = vsel %vm384_vm1, %v736_v3, %v740_v31 }
  0xe7   : > { %v872_v40 = vpop.permute.xlu1 %871  ;;  %v1136_v50 = vsel %vm1126_vm9, %v1103_v44, %v870_v36  ;;  %v775_v36 = vrot.slane %v2225_v17, 1 }
  0xe8   : > { %766 = vrot.lane.b32.xlu0 %v552_v4, %s2340_s8  ;;  %v1138_v57 = vsel %vm1126_vm9, %v1105_v56, %v872_v40  ;;  %v576_v4 = vsel %vm384_vm1, %v571_v59, %v575_v61  ;;  %v852_v40 = vshll.u32 %v2226_v32, 16 }
  0xe9   : > { %768 = vrot.lane.b32.xlu1 %v564_v37, %s2340_s8  ;;  %v776_v46 = vsel %vm609_vm0, %v774_v35, %v775_v36 }
  0xea   : > { %v905_v30 = vpop.permute.xlu0 %904  ;;  %v854_v51 = vrot.slane %v852_v40, 1 }
  0xeb   : > { %v590_v53 = vpop.permute.xlu1 %589  ;;  %v1169_v54 = vsel %vm1159_vm10, %v1136_v50, %v905_v30 }
  0xec   : > { %801 = vrot.lane.b32.xlu0 %v651_v13, %s2337_s5  ;;  %2087 = vmatprep.mubr.msk.bf16.mxu0 %vm1212_vm11, %v1169_v54  ;;  %v942_v33 = vsel %vm928_vm3, %v2533_v14, %v590_v53  ;;  %v855_v59 = vor.u32 %v854_v51, %v850_v47 }
  0xed   : > { %803 = vrot.lane.b32.xlu1 %v654_v45, %s2337_s5 }
  0xee   : > { %v907_v58 = vpop.permute.xlu0 %906 }
  0xef   : > { %v592_v62 = vpop.permute.xlu1 %591  ;;  %v1171_v63 = vsel %vm1159_vm10, %v1138_v57, %v907_v58 }
  0xf0   : > { %838 = vrot.lane.b32.xlu0 %v2725_v11, %s2341_s9  ;;  %2088 = vmatmul.mubr.msk.bf16.gmra.mxu0 %vm1212_vm11, %v1171_v63  ;;  %v944_v42 = vsel %vm928_vm3, %v2546_v23, %v592_v62  ;;  %v857_v23 = vshll.u32 %v2227_v48, 16 }
  0xf1   : > { %840 = vrot.lane.b32.xlu1 %v2738_v29, %s2341_s9 }
  0xf2   : > { %v671_v2 = vpop.permute.xlu0 %670  ;;  %v859_v61 = vrot.slane %v857_v23, 1 }
  0xf3   : > { %v673_v5 = vpop.permute.xlu1 %672  ;;  %v975_v34 = vsel %vm961_vm4, %v942_v33, %v671_v2 }
  0xf4   : > { %885 = vrot.lane.b32.xlu0 %v564_v37, %s2342_s10  ;;  %v977_v44 = vsel %vm961_vm4, %v944_v42, %v673_v5  ;;  %v893_v5 = vrot.slane %v2226_v32, 1 }
  0xf5   : > { %887 = vrot.lane.b32.xlu1 %v576_v4, %s2342_s10 }
  0xf6   : > { %v708_v8 = vpop.permute.xlu0 %707 }
  0xf7   : > { %v710_v13 = vpop.permute.xlu1 %709 }
  0xf8   : > { %920 = vrot.lane.b32.xlu0 %v654_v45, %s2343_s23  ;;  %v1010_v50 = vsel %vm994_vm5, %v977_v44, %v710_v13  ;;  %v895_v13 = vsel %vm609_vm0, %v893_v5, %v894_v6 }
  0xf9   : > { %605 = vrot.lane.b32.xlu1 %v564_v37, %s2339_s7  ;;  %v1008_v37 = vsel %vm994_vm5, %v975_v34, %v708_v8 }
  0xfa   : > { %v755_v16 = vpop.permute.xlu0 %754 }
  0xfb   : > { %v757_v19 = vpop.permute.xlu1 %756  ;;  %v1041_v14 = vsel %vm1027_vm6, %v1008_v37, %v755_v16 }
  0xfc   : > { %922 = vrot.lane.b32.xlu0 %v657_v15, %s2343_s23  ;;  %v1043_v52 = vsel %vm1027_vm6, %v1010_v50, %v757_v19 }
  0xfd   : > { %607 = vrot.lane.b32.xlu1 %v576_v4, %s2339_s7 }
  0xfe   : > { %v790_v20 = vpop.permute.xlu0 %789 }
  0xff   : > { %v792_v25 = vpop.permute.xlu1 %791  ;;  %v1074_v43 = vsel %vm1060_vm7, %v1041_v14, %v790_v20 }
 0x100   : > { %686 = vrot.lane.b32.xlu0 %v654_v45, %s2338_s6  ;;  %v1076_v55 = vsel %vm1060_vm7, %v1043_v52, %v792_v25 }
 0x101   : > { %688 = vrot.lane.b32.xlu1 %v657_v15, %s2338_s6 }
 0x102   : > { %v827_v26 = vpop.permute.xlu0 %826 }
 0x103   : > { %v829_v1 = vpop.permute.xlu1 %828  ;;  %v1107_v45 = vsel %vm1093_vm8, %v1074_v43, %v827_v26 }
 0x104   : > { %723 = vrot.lane.b32.xlu0 %v2738_v29, %s2336_s4  ;;  %v1109_v56 = vsel %vm1093_vm8, %v1076_v55, %v829_v1 }
 0x105   : > { %725 = vrot.lane.b32.xlu1 %v2783_v12, %s2336_s4  ;;  %s1958_s4 = sshll.u32 %s2326_s15, 11 }
 0x106   : > { %v874_v0 = vpop.permute.xlu0 %873 }
 0x107   : > { %v876_v41 = vpop.permute.xlu1 %875  ;;  %v1140_v30 = vsel %vm1126_vm9, %v1107_v45, %v874_v0 }
 0x108   : > { %770 = vrot.lane.b32.xlu0 %v576_v4, %s2340_s8  ;;  %v1142_v57 = vsel %vm1126_vm9, %v1109_v56, %v876_v41  ;;  %v860_v4 = vsel %vm384_vm1, %v855_v59, %v859_v61 }
 0x109   : > { %772 = vrot.lane.b32.xlu1 %v741_v38, %s2340_s8 }
 0x10a   : > { %v909_v60 = vpop.permute.xlu0 %908 }
 0x10b   : > { %v594_v53 = vpop.permute.xlu1 %593  ;;  %v1173_v54 = vsel %vm1159_vm10, %v1140_v30, %v909_v60 }
 0x10c   : > { %805 = vrot.lane.b32.xlu0 %v657_v15, %s2337_s5  ;;  %2091 = vmatprep.mubr.msk.bf16.mxu0 %vm1212_vm11, %v1173_v54  ;;  %v946_v21 = vsel %vm928_vm3, %v2571_v39, %v594_v53 }
 0x10d   : > { %807 = vrot.lane.b32.xlu1 %v776_v46, %s2337_s5  ;;  %s1702_s5 = sshll.u32 %s2901_s30, 4  ;;  %s2945_s5 = int_to_ptr.vmem [resolvable:$true] %s1702_s5 }
 0x10e   : > { %v911_v58 = vpop.permute.xlu0 %910  ;;  %s2228_s11 = scalar_lea.vmem %s2945_s5, 2048  ;;  %p2235_p1 = scmp.lt.s32.totalorder %s2945_s5, %s2233_s19 }
 0x10f   : > { %v596_v62 = vpop.permute.xlu1 %595  ;;  %v1175_v63 = vsel %vm1159_vm10, %v1142_v57, %v911_v58  ;;  %p2229_p12 = scmp.ne.s32.totalorder %s2945_s5, %s2228_s11  ;;  %p2236_p2 = scmp.lt.s32.totalorder %s2234_s21, %s2228_s11 }
 0x110   : > { %842 = vrot.lane.b32.xlu0 %v2783_v12, %s2341_s9  ;;  %2092 = vmatmul.mubr.msk.bf16.gmra.mxu0 %vm1212_vm11, %v1175_v63  ;;  %v948_v31 = vsel %vm928_vm3, %v2584_v49, %v596_v62 }
 0x111   : > { %844 = vrot.lane.b32.xlu1 %v2226_v32, %s2341_s9  ;;  %s2942_s9 = scalar_lea.hbm %s3021_s2, %s1958_s4  ;;  %p2230_p13 = pnand %p2229_p12, %p2407_p4 }
 0x112   : > { %v675_v2 = vpop.permute.xlu0 %674  ;;  %p2237_p3 = por %p2236_p2, %p2235_p1 }
 0x113   : > { %v677_v7 = vpop.permute.xlu1 %676  ;;  %v979_v22 = vsel %vm961_vm4, %v946_v21, %v675_v2  ;;  %p2231_p0 = pneg %p2230_p13 }
 0x114   : > { %889 = vrot.lane.b32.xlu0 %v741_v38, %s2342_s10  ;;  %v981_v1 = vsel %vm961_vm4, %v948_v31, %v677_v7 }
 0x115   : > { %891 = vrot.lane.b32.xlu1 %v860_v4, %s2342_s10  ;;  %s1681_s10 = scalar_lea.sflag [#allocation3], %s2896_s28  ;;  %p2238_p5 = pnand %p2237_p3, %p2231_p0 }
 0x116   : > { %v712_v8 = vpop.permute.xlu0 %711 }
 0x117   : > { %v714_v15 = vpop.permute.xlu1 %713  ;;  %v1012_v24 = vsel %vm994_vm5, %v979_v22, %v712_v8 }
 0x118   : > { %924 = vrot.lane.b32.xlu0 %v776_v46, %s2343_s23  ;;  %v1014_v34 = vsel %vm994_vm5, %v981_v1, %v714_v15 }
 0x119   : > { %926 = vrot.lane.b32.xlu1 %v895_v13, %s2343_s23 }
 0x11a   : > { %v759_v12 = vpop.permute.xlu0 %758 }
 0x11b   : > { %v761_v16 = vpop.permute.xlu1 %760  ;;  %v1045_v26 = vsel %vm1027_vm6, %v1012_v24, %v759_v12 }
 0x11c   : > { %v1047_v36 = vsel %vm1027_vm6, %v1014_v34, %v761_v16 }
 0x11e   : > { %v794_v17 = vpop.permute.xlu0 %793 }
 0x11f   : > { %v796_v18 = vpop.permute.xlu1 %795  ;;  %v1078_v32 = vsel %vm1060_vm7, %v1045_v26, %v794_v17 }
 0x120   : > { %v1080_v38 = vsel %vm1060_vm7, %v1047_v36, %v796_v18 }
 0x122   : > { %v831_v19 = vpop.permute.xlu0 %830 }
 0x123   : > { %v833_v20 = vpop.permute.xlu1 %832  ;;  %v1111_v33 = vsel %vm1093_vm8, %v1078_v32, %v831_v19 }
 0x124   : > { %v1113_v49 = vsel %vm1093_vm8, %v1080_v38, %v833_v20 }
 0x126   : > { %v878_v25 = vpop.permute.xlu0 %877 }
 0x127   : > { %v880_v3 = vpop.permute.xlu1 %879  ;;  %v1144_v39 = vsel %vm1126_vm9, %v1111_v33, %v878_v25 }
 0x128   : > { %v1146_v48 = vsel %vm1126_vm9, %v1113_v49, %v880_v3 }
 0x12a   : > { %v913_v35 = vpop.permute.xlu0 %912 }
 0x12b   : > { %v598_v37 = vpop.permute.xlu1 %597  ;;  %v1177_v0 = vsel %vm1159_vm10, %v1144_v39, %v913_v35 }
 0x12c   : > { %2095 = vmatprep.mubr.msk.bf16.mxu1 %vm1212_vm11, %v1177_v0  ;;  %v950_v23 = vsel %vm928_vm3, %v2609_v9, %v598_v37 }
 0x12e   : > { %v915_v40 = vpop.permute.xlu0 %914 }
 0x12f   : > { %v600_v14 = vpop.permute.xlu1 %599  ;;  %v1179_v41 = vsel %vm1159_vm10, %v1146_v48, %v915_v40 }
 0x130   : > { %2096 = vmatmul.mubr.msk.bf16.vlgmr.msra.gmra.mxu1 %vm1212_vm11, %v1179_v41  ;;  %v952_v57 = vsel %vm928_vm3, %v2627_v28, %v600_v14 }
 0x132   : > { %v679_v42 = vpop.permute.xlu0 %678 }
 0x133   : > { %v681_v43 = vpop.permute.xlu1 %680  ;;  %v983_v52 = vsel %vm961_vm4, %v950_v23, %v679_v42 }
 0x134   : > { %v985_v59 = vsel %vm961_vm4, %v952_v57, %v681_v43 }
 0x136   : > { %v716_v44 = vpop.permute.xlu0 %715 }
 0x137   : > { %v718_v45 = vpop.permute.xlu1 %717  ;;  %v1016_v53 = vsel %vm994_vm5, %v983_v52, %v716_v44 }
 0x138   : > { %v1018_v62 = vsel %vm994_vm5, %v985_v59, %v718_v45 }
 0x13a   : > { %v763_v46 = vpop.permute.xlu0 %762 }
 0x13b   : > { %v765_v47 = vpop.permute.xlu1 %764  ;;  %v1049_v55 = vsel %vm1027_vm6, %v1016_v53, %v763_v46 }
 0x13c   : > { %v1051_v2 = vsel %vm1027_vm6, %v1018_v62, %v765_v47 }
 0x13e   : > { %v798_v50 = vpop.permute.xlu0 %797 }
 0x13f   : > { %v800_v30 = vpop.permute.xlu1 %799  ;;  %v1082_v58 = vsel %vm1060_vm7, %v1049_v55, %v798_v50 }
 0x140   : > { %v1084_v6 = vsel %vm1060_vm7, %v1051_v2, %v800_v30 }
 0x142   : > { %v835_v60 = vpop.permute.xlu0 %834 }
 0x143   : > { %v837_v51 = vpop.permute.xlu1 %836  ;;  %v1115_v61 = vsel %vm1093_vm8, %v1082_v58, %v835_v60 }
 0x144   : > { %v1117_v28 = vsel %vm1093_vm8, %v1084_v6, %v837_v51 }
 0x146   : > { %v882_v54 = vpop.permute.xlu0 %881 }
 0x147   : > { %v884_v56 = vpop.permute.xlu1 %883  ;;  %v1148_v9 = vsel %vm1126_vm9, %v1115_v61, %v882_v54 }
 0x148   : > { %v1150_v7 = vsel %vm1126_vm9, %v1117_v28, %v884_v56 }
 0x14a   : > { %v917_v63 = vpop.permute.xlu0 %916 }
 0x14b   : > { %v602_v4 = vpop.permute.xlu1 %601  ;;  %v1181_v5 = vsel %vm1159_vm10, %v1148_v9, %v917_v63 }
 0x14c   : > { %2099 = vmatprep.mubr.msk.bf16.mxu1 %vm1212_vm11, %v1181_v5  ;;  %v954_v26 = vsel %vm928_vm3, %v2667_v10, %v602_v4 }
 0x14e   : > { %v919_v8 = vpop.permute.xlu0 %918 }
 0x14f   : > { %v604_v13 = vpop.permute.xlu1 %603  ;;  %v1183_v15 = vsel %vm1159_vm10, %v1150_v7, %v919_v8 }
 0x150   : > { %2100 = vmatmul.mubr.msk.bf16.gmra.mxu1 %vm1212_vm11, %v1183_v15  ;;  %v956_v34 = vsel %vm928_vm3, %v2680_v27, %v604_v13 }
 0x152   : > { %v683_v12 = vpop.permute.xlu0 %682 }
 0x153   : > { %v685_v16 = vpop.permute.xlu1 %684  ;;  %v987_v3 = vsel %vm961_vm4, %v954_v26, %v683_v12 }
 0x154   : > { %v989_v35 = vsel %vm961_vm4, %v956_v34, %v685_v16 }
 0x156   : > { %v720_v17 = vpop.permute.xlu0 %719 }
 0x157   : > { %v722_v18 = vpop.permute.xlu1 %721  ;;  %v1020_v31 = vsel %vm994_vm5, %v987_v3, %v720_v17 }
 0x158   : > { %v1022_v10 = vsel %vm994_vm5, %v989_v35, %v722_v18 }
 0x15a   : > { %v767_v19 = vpop.permute.xlu0 %766 }
 0x15b   : > { %v769_v20 = vpop.permute.xlu1 %768  ;;  %v1053_v1 = vsel %vm1027_vm6, %v1020_v31, %v767_v19 }
 0x15c   : > { %v1055_v38 = vsel %vm1027_vm6, %v1022_v10, %v769_v20 }
 0x15e   : > { %v802_v21 = vpop.permute.xlu0 %801 }
 0x15f   : > { %v804_v22 = vpop.permute.xlu1 %803  ;;  %v1086_v39 = vsel %vm1060_vm7, %v1053_v1, %v802_v21 }
 0x160   : > { %v1088_v40 = vsel %vm1060_vm7, %v1055_v38, %v804_v22 }
 0x162   : > { %v839_v24 = vpop.permute.xlu0 %838 }
 0x163   : > { %v841_v25 = vpop.permute.xlu1 %840  ;;  %v1119_v36 = vsel %vm1093_vm8, %v1086_v39, %v839_v24 }
 0x164   : > { %v1121_v27 = vsel %vm1093_vm8, %v1088_v40, %v841_v25 }
 0x166   : > { %v886_v32 = vpop.permute.xlu0 %885 }
 0x167   : > { %v888_v33 = vpop.permute.xlu1 %887  ;;  %v1152_v37 = vsel %vm1126_vm9, %v1119_v36, %v886_v32 }
 0x168   : > { %v1154_v14 = vsel %vm1126_vm9, %v1121_v27, %v888_v33 }
 0x16a   : > { %v921_v0 = vpop.permute.xlu0 %920 }
 0x16b   : > { %v606_v49 = vpop.permute.xlu1 %605  ;;  %v1185_v48 = vsel %vm1159_vm10, %v1152_v37, %v921_v0 }
 0x16c   : > { %2103 = vmatprep.mubr.msk.bf16.mxu1 %vm1212_vm11, %v1185_v48  ;;  %v958_v7 = vsel %vm928_vm3, %v2725_v11, %v606_v49 }
 0x16e   : > { %v923_v41 = vpop.permute.xlu0 %922 }
 0x16f   : > { %v608_v42 = vpop.permute.xlu1 %607  ;;  %v1187_v43 = vsel %vm1159_vm10, %v1154_v14, %v923_v41 }
 0x170   : > { %v2081_v44 = vpop.f32.mrf.mxu0  ;;  %2104 = vmatmul.mubr.msk.bf16.gmra.mxu1 %vm1212_vm11, %v1187_v43  ;;  %v960_v8 = vsel %vm928_vm3, %v2738_v29, %v608_v42 }
 0x171   : > { %v1609_v56 = vmul.f32 %v2081_v44, %v2081_v44 }
 0x172   : > { %v1283_v45 = vpop.f32.mrf.mxu0  ;;  %v687_v46 = vpop.permute.xlu0 %686 }
 0x173   : > { %v689_v47 = vpop.permute.xlu1 %688  ;;  %v1607_v23 = vmul.f32 %v1283_v45, %v1283_v45  ;;  %v991_v13 = vsel %vm961_vm4, %v958_v7, %v687_v46 }
 0x174   : > { %v2082_v50 = vpop.f32.mrf.mxu0  ;;  %v993_v15 = vsel %vm961_vm4, %v960_v8, %v689_v47 }
 0x175   : > { %v1967_v30 = vpack.c.bf16 %v2082_v50, %v2081_v44  ;;  %v1610_v61 = vmul.f32 %v2082_v50, %v2082_v50 }
 0x176   : > { %v1286_v60 = vpop.f32.mrf.mxu0  ;;  %v724_v51 = vpop.permute.xlu0 %723 }
 0x177   : > { %2039 = vst [vmem:[%s2901_s30 + $0x8] sm:$0xff] %v1967_v30   ;;  %v726_v52 = vpop.permute.xlu1 %725  ;;  %v1962_v53 = vpack.c.bf16 %v1286_v60, %v1283_v45  ;;  %v1570_v54 = vadd.f32 %v1286_v60, %v1283_v45  ;;  %v1608_v55 = vmul.f32 %v1286_v60, %v1286_v60  ;;  %v1024_v12 = vsel %vm994_vm5, %v991_v13, %v724_v51 }
 0x178   : > { %v1026_v17 = vsel %vm994_vm5, %v993_v15, %v726_v52 }
 0x179   : > { %1963 = vst [vmem:[%s2901_s30] sm:$0xff] %v1962_v53   ;;  %v1571_v57 = vadd.f32 %v2081_v44, %v1570_v54  ;;  %v1639_v58 = vadd.f32 %v1608_v55, %v1607_v23 }
 0x17a   : > { %v771_v59 = vpop.permute.xlu0 %770 }
 0x17b   : > { %v1640_v62 = vadd.f32 %v1639_v58, %v1609_v56  ;;  %v773_v9 = vpop.permute.xlu1 %772  ;;  %v1572_v63 = vadd.f32 %v2082_v50, %v1571_v57  ;;  %v1057_v18 = vsel %vm1027_vm6, %v1024_v12, %v771_v59 }
 0x17c   : > { %v1059_v20 = vsel %vm1027_vm6, %v1026_v17, %v773_v9 }
 0x17d   : > { %v1641_v2 = vadd.f32 %v1640_v62, %v1610_v61 }
 0x17e   : > { %v806_v4 = vpop.permute.xlu0 %805 }
 0x17f   : > { %v808_v5 = vpop.permute.xlu1 %807  ;;  %v1090_v21 = vsel %vm1060_vm7, %v1057_v18, %v806_v4 }
 0x180   : > { %v1092_v11 = vsel %vm1060_vm7, %v1059_v20, %v808_v5 }
 0x182   : > { %v843_v6 = vpop.permute.xlu0 %842 }
 0x183   : > { %v845_v28 = vpop.permute.xlu1 %844  ;;  %v1123_v29 = vsel %vm1093_vm8, %v1090_v21, %v843_v6 }
 0x184   : > { %v1125_v22 = vsel %vm1093_vm8, %v1092_v11, %v845_v28 }
 0x186   : > { %v890_v16 = vpop.permute.xlu0 %889 }
 0x187   : > { %v892_v19 = vpop.permute.xlu1 %891  ;;  %v1156_v24 = vsel %vm1126_vm9, %v1123_v29, %v890_v16 }
 0x188   : > { %v1158_v26 = vsel %vm1126_vm9, %v1125_v22, %v892_v19 }
 0x18a   : > { %v925_v25 = vpop.permute.xlu0 %924 }
 0x18b   : > { %v927_v3 = vpop.permute.xlu1 %926  ;;  %v1189_v31 = vsel %vm1159_vm10, %v1156_v24, %v925_v25 }
 0x18c   : > { %v1191_v32 = vsel %vm1159_vm10, %v1158_v26, %v927_v3  ;;  %2107 = vmatprep.mubr.msk.bf16.mxu1 %vm1212_vm11, %v1189_v31 }
 0x18d   : > { %2108 = vmatmul.mubr.msk.bf16.gmra.mxu1 %vm1212_vm11, %v1191_v32 }
 0x190   : > { %v2085_v1 = vpop.f32.mrf.mxu0 }
 0x191   : > { %v1613_v48 = vmul.f32 %v2085_v1, %v2085_v1 }
 0x192   : > { %v1299_v33 = vpop.f32.mrf.mxu0 }
 0x193   : > { %v1573_v34 = vadd.f32 %v1572_v63, %v1299_v33  ;;  %v1611_v39 = vmul.f32 %v1299_v33, %v1299_v33 }
 0x194   : > { %v2086_v35 = vpop.f32.mrf.mxu0 }
 0x195   : > { %v1642_v36 = vadd.f32 %v1641_v2, %v1611_v39  ;;  %v1977_v10 = vpack.c.bf16 %v2086_v35, %v2085_v1  ;;  %v1614_v14 = vmul.f32 %v2086_v35, %v2086_v35 }
 0x196   : > { %v1302_v37 = vpop.f32.mrf.mxu0 }
 0x197   : > { %2041 = vst [vmem:[%s2901_s30 + $0x18] sm:$0xff] %v1977_v10   ;;  %v1972_v0 = vpack.c.bf16 %v1302_v37, %v1299_v33  ;;  %v1574_v38 = vadd.f32 %v1573_v34, %v1302_v37  ;;  %v1612_v49 = vmul.f32 %v1302_v37, %v1302_v37 }
 0x199   : > { %2040 = vst [vmem:[%s2901_s30 + $0x10] sm:$0xff] %v1972_v0   ;;  %v1575_v40 = vadd.f32 %v2085_v1, %v1574_v38  ;;  %v1643_v27 = vadd.f32 %v1642_v36, %v1612_v49 }
 0x19b   : > { %v1644_v41 = vadd.f32 %v1643_v27, %v1613_v48  ;;  %v1576_v42 = vadd.f32 %v2086_v35, %v1575_v40 }
 0x19d   : > { %v1645_v43 = vadd.f32 %v1644_v41, %v1614_v14 }
 0x1b0   : > { %v2089_v44 = vpop.f32.mrf.mxu0 }
 0x1b1   : > { %v1617_v54 = vmul.f32 %v2089_v44, %v2089_v44 }
 0x1b2   : > { %v1315_v45 = vpop.f32.mrf.mxu0 }
 0x1b3   : > { %v1577_v46 = vadd.f32 %v1576_v42, %v1315_v45  ;;  %v1615_v47 = vmul.f32 %v1315_v45, %v1315_v45 }
 0x1b4   : > { %v2090_v50 = vpop.f32.mrf.mxu0 }
 0x1b5   : > { %v1646_v30 = vadd.f32 %v1645_v43, %v1615_v47  ;;  %v1987_v60 = vpack.c.bf16 %v2090_v50, %v2089_v44  ;;  %v1618_v57 = vmul.f32 %v2090_v50, %v2090_v50 }
 0x1b6   : > { %v1318_v51 = vpop.f32.mrf.mxu0 }
 0x1b7   : > { %2043 = vst [vmem:[%s2901_s30 + $0x28] sm:$0xff] %v1987_v60   ;;  %v1982_v23 = vpack.c.bf16 %v1318_v51, %v1315_v45  ;;  %v1578_v52 = vadd.f32 %v1577_v46, %v1318_v51  ;;  %v1616_v53 = vmul.f32 %v1318_v51, %v1318_v51 }
 0x1b9   : > { %2042 = vst [vmem:[%s2901_s30 + $0x20] sm:$0xff] %v1982_v23   ;;  %v1579_v55 = vadd.f32 %v2089_v44, %v1578_v52  ;;  %v1647_v56 = vadd.f32 %v1646_v30, %v1616_v53 }
 0x1bb   : > { %v1648_v58 = vadd.f32 %v1647_v56, %v1617_v54  ;;  %v1580_v59 = vadd.f32 %v2090_v50, %v1579_v55 }
 0x1bd   : > { %v1649_v61 = vadd.f32 %v1648_v58, %v1618_v57 }
 0x1d0   : > { %v2093_v62 = vpop.f32.mrf.mxu0 }
 0x1d1   : > { %v1621_v15 = vmul.f32 %v2093_v62, %v2093_v62 }
 0x1d2   : > { %v1331_v9 = vpop.f32.mrf.mxu0 }
 0x1d3   : > { %v1581_v63 = vadd.f32 %v1580_v59, %v1331_v9  ;;  %v1619_v2 = vmul.f32 %v1331_v9, %v1331_v9 }
 0x1d4   : > { %v2094_v4 = vpop.f32.mrf.mxu0 }
 0x1d5   : > { %v1650_v5 = vadd.f32 %v1649_v61, %v1619_v2  ;;  %v1997_v6 = vpack.c.bf16 %v2094_v4, %v2093_v62  ;;  %v1622_v17 = vmul.f32 %v2094_v4, %v2094_v4 }
 0x1d6   : > { %v1334_v28 = vpop.f32.mrf.mxu0 }
 0x1d7   : > { %2045 = vst [vmem:[%s2901_s30 + $0x38] sm:$0xff] %v1997_v6   ;;  %v1992_v7 = vpack.c.bf16 %v1334_v28, %v1331_v9  ;;  %v1582_v8 = vadd.f32 %v1581_v63, %v1334_v28  ;;  %v1620_v13 = vmul.f32 %v1334_v28, %v1334_v28 }
 0x1d9   : > { %2044 = vst [vmem:[%s2901_s30 + $0x30] sm:$0xff] %v1992_v7   ;;  %v1583_v12 = vadd.f32 %v2093_v62, %v1582_v8  ;;  %v1651_v16 = vadd.f32 %v1650_v5, %v1620_v13 }
 0x1db   : > { %v1652_v18 = vadd.f32 %v1651_v16, %v1621_v15  ;;  %v1584_v19 = vadd.f32 %v2094_v4, %v1583_v12 }
 0x1dd   : > { %v1653_v20 = vadd.f32 %v1652_v18, %v1622_v17 }
 0x1f0   : > { %v2097_v21 = vpop.f32.mrf.mxu1 }
 0x1f1   : > { %v1625_v33 = vmul.f32 %v2097_v21, %v2097_v21 }
 0x1f2   : > { %v1347_v11 = vpop.f32.mrf.mxu1 }
 0x1f3   : > { %v1585_v29 = vadd.f32 %v1584_v19, %v1347_v11  ;;  %v1623_v22 = vmul.f32 %v1347_v11, %v1347_v11 }
 0x1f4   : > { %v2098_v24 = vpop.f32.mrf.mxu1 }
 0x1f5   : > { %v1654_v25 = vadd.f32 %v1653_v20, %v1623_v22  ;;  %v2007_v26 = vpack.c.bf16 %v2098_v24, %v2097_v21  ;;  %v1626_v35 = vmul.f32 %v2098_v24, %v2098_v24 }
 0x1f6   : > { %v1350_v3 = vpop.f32.mrf.mxu1 }
 0x1f7   : > { %2047 = vst [vmem:[%s2901_s30 + $0x48] sm:$0xff] %v2007_v26   ;;  %v2002_v31 = vpack.c.bf16 %v1350_v3, %v1347_v11  ;;  %v1586_v32 = vadd.f32 %v1585_v29, %v1350_v3  ;;  %v1624_v1 = vmul.f32 %v1350_v3, %v1350_v3 }
 0x1f9   : > { %2046 = vst [vmem:[%s2901_s30 + $0x40] sm:$0xff] %v2002_v31   ;;  %v1587_v34 = vadd.f32 %v2097_v21, %v1586_v32  ;;  %v1655_v39 = vadd.f32 %v1654_v25, %v1624_v1 }
 0x1fb   : > { %v1656_v36 = vadd.f32 %v1655_v39, %v1625_v33  ;;  %v1588_v10 = vadd.f32 %v2098_v24, %v1587_v34 }
 0x1fd   : > { %v1657_v37 = vadd.f32 %v1656_v36, %v1626_v35 }
 0x210   : > { %v2101_v0 = vpop.f32.mrf.mxu1 }
 0x211   : > { %v1629_v23 = vmul.f32 %v2101_v0, %v2101_v0 }
 0x212   : > { %v1363_v38 = vpop.f32.mrf.mxu1 }
 0x213   : > { %v1627_v46 = vmul.f32 %v1363_v38, %v1363_v38  ;;  %v1589_v47 = vadd.f32 %v1588_v10, %v1363_v38 }
 0x214   : > { %v2102_v49 = vpop.f32.mrf.mxu1 }
 0x215   : > { %v2017_v48 = vpack.c.bf16 %v2102_v49, %v2101_v0  ;;  %v1658_v30 = vadd.f32 %v1657_v37, %v1627_v46  ;;  %v1630_v54 = vmul.f32 %v2102_v49, %v2102_v49 }
 0x216   : > { %v1366_v40 = vpop.f32.mrf.mxu1 }
 0x217   : > { %2049 = vst [vmem:[%s2901_s30 + $0x58] sm:$0xff] %v2017_v48   ;;  %v2012_v27 = vpack.c.bf16 %v1366_v40, %v1363_v38  ;;  %v1628_v50 = vmul.f32 %v1366_v40, %v1366_v40  ;;  %v1590_v60 = vadd.f32 %v1589_v47, %v1366_v40 }
 0x219   : > { %2048 = vst [vmem:[%s2901_s30 + $0x50] sm:$0xff] %v2012_v27   ;;  %v1659_v51 = vadd.f32 %v1658_v30, %v1628_v50  ;;  %v1591_v52 = vadd.f32 %v2101_v0, %v1590_v60 }
 0x21b   : > { %v1660_v53 = vadd.f32 %v1659_v51, %v1629_v23  ;;  %v1592_v55 = vadd.f32 %v2102_v49, %v1591_v52 }
 0x21d   : > { %v1661_v58 = vadd.f32 %v1660_v53, %v1630_v54 }
 0x230   : > { %v2105_v14 = vpop.f32.mrf.mxu1 }
 0x231   : > { %v1633_v63 = vmul.f32 %v2105_v14, %v2105_v14 }
 0x232   : > { %v1379_v41 = vpop.f32.mrf.mxu1 }
 0x233   : > { %v1631_v56 = vmul.f32 %v1379_v41, %v1379_v41  ;;  %v1593_v57 = vadd.f32 %v1592_v55, %v1379_v41 }
 0x234   : > { %v2106_v42 = vpop.f32.mrf.mxu1 }
 0x235   : > { %v2027_v43 = vpack.c.bf16 %v2106_v42, %v2105_v14  ;;  %v1662_v61 = vadd.f32 %v1661_v58, %v1631_v56  ;;  %v1634_v28 = vmul.f32 %v2106_v42, %v2106_v42 }
 0x236   : > { %v1382_v44 = vpop.f32.mrf.mxu1 }
 0x237   : > { %2051 = vst [vmem:[%s2901_s30 + $0x68] sm:$0xff] %v2027_v43   ;;  %v2022_v45 = vpack.c.bf16 %v1382_v44, %v1379_v41  ;;  %v1632_v59 = vmul.f32 %v1382_v44, %v1382_v44  ;;  %v1594_v62 = vadd.f32 %v1593_v57, %v1382_v44 }
 0x239   : > { %2050 = vst [vmem:[%s2901_s30 + $0x60] sm:$0xff] %v2022_v45   ;;  %v1663_v9 = vadd.f32 %v1662_v61, %v1632_v59  ;;  %v1595_v2 = vadd.f32 %v2105_v14, %v1594_v62 }
 0x23b   : > { %v1664_v5 = vadd.f32 %v1663_v9, %v1633_v63  ;;  %v1596_v7 = vadd.f32 %v2106_v42, %v1595_v2 }
 0x23d   : > { %v1665_v12 = vadd.f32 %v1664_v5, %v1634_v28 }
 0x24d   : > { %v2109_v4 = vpop.f32.mrf.mxu1 }
 0x24e   : > { %v1637_v11 = vmul.f32 %v2109_v4, %v2109_v4 }
 0x24f   : > { %v1395_v6 = vpop.f32.mrf.mxu1 }
 0x250   : > { %v1635_v8 = vmul.f32 %v1395_v6, %v1395_v6  ;;  %v1597_v15 = vadd.f32 %v1596_v7, %v1395_v6 }
 0x251   : > { %v2110_v13 = vpop.f32.mrf.mxu1 }
 0x252   : > { %v2037_v16 = vpack.c.bf16 %v2110_v13, %v2109_v4  ;;  %v1666_v18 = vadd.f32 %v1665_v12, %v1635_v8 }
 0x253   : > { %v1398_v17 = vpop.f32.mrf.mxu1 }
 0x254   : > { %2053 = vst [vmem:[%s2901_s30 + $0x78] sm:$0xff] %v2037_v16   ;;  %v2032_v19 = vpack.c.bf16 %v1398_v17, %v1395_v6  ;;  %v1598_v20 = vadd.f32 %v1597_v15, %v1398_v17  ;;  %v1636_v21 = vmul.f32 %v1398_v17, %v1398_v17 }
 0x256   : > { %2052 = vst [vmem:[%s2901_s30 + $0x70] sm:$0xff] %v2032_v19   ;;  %v1599_v29 = vadd.f32 %v2109_v4, %v1598_v20  ;;  %v1667_v22 = vadd.f32 %v1666_v18, %v1636_v21 }
 0x257   : > { %2241 = shalt.err (!%p2238_p5)
}
 0x258   : > { %s2242_s23 = scalar_lea.hbm %s2942_s9, 2048  ;;  %s2246_s29 = scalar_lea.hbm %s3021_s2, 4096 }
 0x259   : > { %p2243_p6 = scmp.ne.s32.totalorder %s2942_s9, %s2242_s23  ;;  %p2247_p10 = scmp.lt.s32.totalorder %s2942_s9, %s3021_s2 }
 0x25a   : > { %p2248_p11 = scmp.lt.s32.totalorder %s2246_s29, %s2242_s23 }
 0x25b   : > { %p2244_p7 = pnand %p2243_p6, %p2407_p4 }
 0x25c   : > { %p2249_p12 = por %p2248_p11, %p2247_p10 }
 0x25d   : > { %p2245_p9 = pneg %p2244_p7 }
 0x25f   : > { %p2250_p13 = pnand %p2249_p12, %p2245_p9 }
 0x261   : > { %2253 = shalt.err (!%p2250_p13)
}
 0x262   : > { %s2345_s6 = smov 64   ;;  %v1638_v24 = vmul.f32 %v2110_v13, %v2110_v13  ;;  %v1600_v25 = vadd.f32 %v2110_v13, %v1599_v29  ;;  %v1668_v26 = vadd.f32 %v1667_v22, %v1637_v11  ;;  %s1830_s8 = sshll.u32 %s2896_s28, 3  ;;  %vm1676_vm12 = vcmask 1040384  }
 0x263   : > { %2120 = dma.vmem_to_hbm [thread:$0]  (%p2407_p4), %s2945_s5, 2048, %s2942_s9, %s1681_s10, %s2345_s6, %s2345_s6, %s2339_s7  }
 0x264   : > { %v1601_v3 = vrot.slane %v1600_v25, 4  ;;  %v1669_v31 = vadd.f32 %v1668_v26, %v1638_v24  ;;  %s1923_s7 = sshll.u32 %s2326_s15, 7  ;;  %s190_s5 = scalar_lea.vmem [#allocation4], %s1830_s8 }
 0x265   : > { %s1719_s9 = sshll.u32 %s190_s5, 4  ;;  %s2977_s18 = scalar_lea.hbm %s3022_s3, %s1923_s7  ;;  %s1720_s9 = int_to_ptr.vmem [resolvable:$true] %s1719_s9 }
 0x266   : > { %v1602_v32 = vadd.f32 %v1601_v3, %v1600_v25  ;;  %v1670_v1 = vrot.slane %v1669_v31, 4  ;;  %s1686_s19 = scalar_lea.sflag [#allocation5], %s2896_s28  ;;  %s2254_s21 = scalar_lea.vmem %s1720_s9, 128 }
 0x267   : > { %p2255_p0 = scmp.ne.s32.totalorder %s1720_s9, %s2254_s21  ;;  %s2346_s15 = smov [#allocation4]  }
 0x268   : > { %v1603_v33 = vrot.slane %v1602_v32, 2  ;;  %v1671_v34 = vadd.f32 %v1670_v1, %v1669_v31  ;;  %s2258_s23 = sshll.u32 %s2346_s15, 4  ;;  %s2259_s23 = int_to_ptr.vmem [resolvable:$false] %s2258_s23 }
 0x269   : > { %p2256_p1 = pnand %p2255_p0, %p2407_p4  ;;  %s2260_s26 = scalar_lea.vmem %s2259_s23, 256 }
 0x26a   : > { %v1604_v39 = vadd.f32 %v1603_v33, %v1602_v32  ;;  %v1672_v35 = vrot.slane %v1671_v34, 2  ;;  %p2261_p3 = scmp.lt.s32.totalorder %s1720_s9, %s2259_s23  ;;  %p2262_p5 = scmp.lt.s32.totalorder %s2260_s26, %s2254_s21 }
 0x26b   : > { %p2257_p2 = pneg %p2256_p1 }
 0x26c   : > { %v1605_v36 = vrot.slane %v1604_v39, 1  ;;  %v1673_v10 = vadd.f32 %v1672_v35, %v1671_v34  ;;  %p2263_p6 = por %p2262_p5, %p2261_p3 }
 0x26e   : > { %v1674_v37 = vrot.slane %v1673_v10, 1  ;;  %v1606_v0 = vadd.f32 %v1605_v36, %v1604_v39  ;;  %p2264_p7 = pnand %p2263_p6, %p2257_p2 }
 0x270   : > { %v1675_v38 = vadd.f32 %v1674_v37, %v1673_v10 }
 0x272   : > { %v1677_v49 = vsel %vm1676_vm12, %v1606_v0, %v1675_v38 }
 0x273   : > { %v1678_v48 = vsel %vm1245_vm2, %v1677_v49, 0.0 }
 0x274   : > { %1679 = vst [vmem:[%s190_s5] sm:$0xff] %v1678_v48 }
 0x275   : > { %2267 = shalt.err (!%p2264_p7)
}
 0x276   : > { %s2268_s27 = scalar_lea.hbm %s2977_s18, 128  ;;  %s2272_s30 = scalar_lea.hbm %s3022_s3, 256 }
 0x277   : > { %p2269_p9 = scmp.ne.s32.totalorder %s2977_s18, %s2268_s27  ;;  %p2273_p12 = scmp.lt.s32.totalorder %s2977_s18, %s3022_s3 }
 0x278   : > { %p2274_p13 = scmp.lt.s32.totalorder %s2272_s30, %s2268_s27 }
 0x279   : > { %p2270_p10 = pnand %p2269_p9, %p2407_p4 }
 0x27a   : > { %p2275_p0 = por %p2274_p13, %p2273_p12 }
 0x27b   : > { %p2271_p11 = pneg %p2270_p10 }
 0x27d   : > { %p2276_p1 = pnand %p2275_p0, %p2271_p11 }
 0x27f   : > { %2279 = shalt.err (!%p2276_p1)
}
 0x280   : > { %2121 = dma.vmem_to_hbm [thread:$0]  (%p2407_p4), %s1720_s9, 128, %s2977_s18, %s1686_s19  }
 0x281 PF: > { %p2131_p2 = scmp.ge.s32.totalorder %s2334_s17, 2  ;;  %s1731_s8 = sand.u32 1, %s2314_s12  }
 0x282   : > { %s1732_s7 = scalar_lea.sflag [#allocation3], %s1731_s8 }
 0x283   : > { %p2125_p3 = pnand %p2131_p2, %p2414_p8 }
 0x285   : > { %p2126_p5 = pneg %p2125_p3 }
 0x287   : > { %2305 = dma.done.wait (%p2126_p5), %s1732_s7, 2048  }
 0x288   : > { %2307 = vsyncadd (%p2126_p5), %s1732_s7, 4294965248  ;;  %s1741_s5 = scalar_lea.sflag [#allocation5], %s1731_s8 }
 0x289   : > { %2309 = dma.done.wait (%p2126_p5), %s1741_s5, 128  }
 0x28a   : > { %2311 = vsyncadd (%p2126_p5), %s1741_s5, 4294967168  ;;  %s20_s17 = sadd.s32 1, %s2334_s17   ;;  %s3025_s12 = smov %s2318_s13 }
 0x28b   : > { %p17_p6 = scmp.ge.s32.totalorder %s20_s17, 4   ;;  %s3026_s13 = smov %s2322_s14 }
 0x28c   : > { %s3027_s14 = smov %s2420_s25  ;;  %s3028_s15 = smov %s2330_s16 }
 0x28d   : > { %s3029_s16 = smov %s3031_s20  ;;  %19 = sbr.rel (!%p17_p6) target bundleno = 6 (0x6), region = 81 }
 0x292   :  { %1746 = vsyncpa [#allocation3], 1 }
 0x293   :  { %1748 = vsyncpa [#allocation3 + $0x1], 1 }
 0x294   :  { %1749 = vsyncpa [#allocation5], 1 }
 0x295   :  { %1751 = vsyncpa [#allocation5 + $0x1], 1 }

</bundles_post_ra>
